<compile_context>
chip_gen: v6e
topology: v6e:2x2x1
jax: 0.10.0
libtpu: 0.0.40
codegen_flags: <defaults>
</compile_context>

<pallas_src>
import jax
import jax.numpy as jnp
import numpy as np
from jax.experimental import pallas as pl
from jax.experimental.pallas import tpu as pltpu


# ----------------------------------------------------------------------------
# Config (small, consistent with the module)
# ----------------------------------------------------------------------------
BATCH = 2
INPUT_VARIABLES = 4
FRAME_SIZE = 16
FREQ_FRAME_SIZE = FRAME_SIZE // 2 + 1      # 9
NUM_FRAMES = 8
K_PAST = 5
K_FUTURE = NUM_FRAMES - K_PAST             # 3
NUM_KERNELS = 8
KERNEL_SIZE = 3
STRIDE = 1
PADDING = 1
NUM_CONV_LAYERS = 1                        # hidden conv blocks
EMBEDDING_DIM = 16
CONTEXT_DIM = 16
BN_EPS = 1e-5

_N_CONV = 2 + NUM_CONV_LAYERS              # in + hidden + out conv layers
LANES = 128

LC_T = INPUT_VARIABLES * FRAME_SIZE        # 64
LK_T = NUM_KERNELS * FRAME_SIZE            # 128
LC_F = INPUT_VARIABLES * FREQ_FRAME_SIZE   # 36
LK_F = NUM_KERNELS * FREQ_FRAME_SIZE       # 72

assert STRIDE == 1 and 2 * PADDING == KERNEL_SIZE - 1, "conv must preserve length"
assert 8 * CONTEXT_DIM <= LANES            # fused LSTM gate slab fits 128 lanes
assert max(LK_T, LK_F, LC_T, LC_F, BATCH * NUM_FRAMES,
           2 * K_FUTURE * EMBEDDING_DIM) <= LANES

_HI = jax.lax.Precision.HIGHEST

# ---- packed output slab layout (rows of a (OUT_ROWS, 128) f32 slab) --------
R_H = 0                                    # rows 0:B*F -> h_T | h_F
R_C = BATCH * NUM_FRAMES                   # rows 16:18 -> c_T|c_F|z_T|z_F
R_NCE = R_C + BATCH                        # row 18     -> nce_TtoF, nce_FtoT
OUT_ROWS = ((R_NCE + 1 + 7) // 8) * 8      # 24


# ---- packed weight slab layout (static row offsets, 128 lanes) -------------
def _build_layout():
    off = {}
    row = 0

    def put(name, nrows):
        nonlocal row
        row = ((row + 7) // 8) * 8          # keep every item 8-row aligned
        off[name] = row
        row += nrows

    for pfx, lc, lk in (("T", LC_T, LK_T), ("F", LC_F, LK_F)):
        put(f"{pfx}_band0", lc)
        for j in range(1, _N_CONV):
            put(f"{pfx}_band{j}", lk)
        for j in range(_N_CONV):
            put(f"{pfx}_cb{j}", 1)
        put(f"{pfx}_linwT", EMBEDDING_DIM)
        put(f"{pfx}_linb", 1)
    put("s_past", K_PAST * BATCH)
    put("s_fut", K_FUTURE * BATCH)
    put("wih_T", EMBEDDING_DIM)
    put("wih_F", EMBEDDING_DIM)
    put("whh", 2 * CONTEXT_DIM)
    put("lstm_b", 1)
    put("pw1", 2 * CONTEXT_DIM)
    put("pb1", 1)
    put("gamma", 1)
    put("beta", 1)
    put("pw2", CONTEXT_DIM)
    put("pb2", 1)
    put("wk", 2 * CONTEXT_DIM)
    put("wkb", 1)
    return off, ((row + 7) // 8) * 8


_OFF, _W_ROWS = _build_layout()


# ----------------------------------------------------------------------------
# The single fused Pallas kernel (2 VMEM input slabs -> 1 VMEM output slab)
# ----------------------------------------------------------------------------
def _cdpcc_kernel(x_ref, w_ref, o_ref):
    B, E, H = BATCH, EMBEDDING_DIM, CONTEXT_DIM
    BF = B * NUM_FRAMES

    def w_at(name, nrows, ncols):
        r0 = _OFF[name]                                   # static Python int
        return w_ref[r0:r0 + nrows, 0:ncols]

    # --- base encoder: each Conv1d(+ReLU, dropout rate 0) is one banded matmul
    def encode(x2d, pfx, lc, lk):
        y = x2d
        rows = lc
        for j in range(_N_CONV):
            band = w_at(f"{pfx}_band{j}", rows, lk)
            cb = w_at(f"{pfx}_cb{j}", 1, lk)
            y = jnp.maximum(
                jnp.dot(y, band, preferred_element_type=jnp.float32) + cb, 0.0)
            rows = lk
        lin_wT = w_at(f"{pfx}_linwT", E, lk)              # (E, lk): transposed W
        lin_b = w_at(f"{pfx}_linb", 1, E)
        h = jax.lax.dot_general(y, lin_wT, (((1,), (1,)), ((), ())),
                                preferred_element_type=jnp.float32) + lin_b
        return h                                          # (B*F, E)

    h_T = encode(x_ref[0:BF, 0:LC_T], "T", LC_T, LK_T)
    h_F = encode(x_ref[BF:2 * BF, 0:LC_F], "F", LC_F, LK_F)

    # --- past / future frame rows via one-hot selection matmuls (time-major) --
    s_past = w_at("s_past", K_PAST * B, BF)
    s_fut = w_at("s_fut", K_FUTURE * B, BF)
    past_T = jnp.dot(s_past, h_T, preferred_element_type=jnp.float32)  # (T*B,E)
    past_F = jnp.dot(s_past, h_F, preferred_element_type=jnp.float32)
    fut_T = jnp.dot(s_fut, h_T, preferred_element_type=jnp.float32)    # (kf*B,E)
    fut_F = jnp.dot(s_fut, h_F, preferred_element_type=jnp.float32)

    # --- fused (block-diagonal, gate-permuted) LSTM over both branches -------
    wih_T = w_at("wih_T", E, 8 * H)
    wih_F = w_at("wih_F", E, 8 * H)
    whh = w_at("whh", 2 * H, 8 * H)
    lstm_b = w_at("lstm_b", 1, 8 * H)
    # x @ W_ih for all steps of both branches hoisted off the recurrence
    gx = (jnp.dot(past_T, wih_T, preferred_element_type=jnp.float32)
          + jnp.dot(past_F, wih_F, preferred_element_type=jnp.float32) + lstm_b)

    hb = jnp.zeros((B, 2 * H), jnp.float32)     # lanes 0:H = branch T, H:2H = F
    cell = jnp.zeros((B, 2 * H), jnp.float32)
    for t in range(K_PAST):                     # fully unrolled (T=5)
        g = gx[t * B:(t + 1) * B, :] + jnp.dot(
            hb, whh, preferred_element_type=jnp.float32)
        sig = jax.nn.sigmoid(g[:, 0:6 * H])     # [i_T|i_F|f_T|f_F|o_T|o_F]
        tng = jnp.tanh(g[:, 6 * H:8 * H])       # [g_T|g_F]
        cell = sig[:, 2 * H:4 * H] * cell + sig[:, 0:2 * H] * tng
        hb = sig[:, 4 * H:6 * H] * jnp.tanh(cell)

    # --- fused projection heads: Linear -> BatchNorm(batch stats) -> ReLU -> Linear
    p = jnp.dot(hb, w_at("pw1", 2 * H, H),
                preferred_element_type=jnp.float32) + w_at("pb1", 1, H)
    mean = jnp.mean(p, axis=0, keepdims=True)
    var = jnp.mean((p - mean) ** 2, axis=0, keepdims=True)
    p = ((p - mean) * jax.lax.rsqrt(var + BN_EPS) * w_at("gamma", 1, H)
         + w_at("beta", 1, H))
    p = jnp.maximum(p, 0.0)
    z = jnp.dot(p, w_at("pw2", H, H // 2),
                preferred_element_type=jnp.float32) + w_at("pb2", 1, H // 2)

    # --- cross-branch future predictions: one matmul for both directions -----
    pred = (jnp.dot(hb, w_at("wk", 2 * H, 2 * K_FUTURE * E),
                    preferred_element_type=jnp.float32)
            + w_at("wkb", 1, 2 * K_FUTURE * E))           # (B, 2*kf*E)

    ii = jax.lax.broadcasted_iota(jnp.int32, (B, B), 0)
    jj = jax.lax.broadcasted_iota(jnp.int32, (B, B), 1)
    diag = ii == jj

    def infonce(fut, col0):
        acc = jnp.float32(0.0)
        for k in range(K_FUTURE):               # fully unrolled (kf=3)
            p_k = pred[:, col0 + k * E:col0 + (k + 1) * E]
            f_k = fut[k * B:(k + 1) * B, :]
            scores = jax.lax.dot_general(       # f_k @ p_k.T without transpose
                f_k, p_k, (((1,), (1,)), ((), ())),
                preferred_element_type=jnp.float32)
            m = jnp.max(scores, axis=-1, keepdims=True)
            lse = m + jnp.log(jnp.sum(jnp.exp(scores - m), axis=-1, keepdims=True))
            acc = acc + jnp.sum(jnp.where(diag, scores - lse, 0.0))
        return acc / (-1.0 * B * K_FUTURE)

    ntf = infonce(fut_F, 0)                     # c_T predicts F futures
    nft = infonce(fut_T, K_FUTURE * E)          # c_F predicts T futures

    # --- assemble ONE lane-dense output slab and store it in a single stream --
    rows_h = jnp.concatenate(
        [h_T, h_F, jnp.zeros((BF, LANES - 2 * E), jnp.float32)], axis=1)
    rows_cz = jnp.concatenate(
        [hb, z, jnp.zeros((B, LANES - 2 * H - H // 2), jnp.float32)], axis=1)
    lane = jax.lax.broadcasted_iota(jnp.int32, (1, LANES), 1)
    row_nce = jnp.where(lane == 0, ntf, jnp.where(lane == 1, nft, 0.0))
    pad = jnp.zeros((OUT_ROWS - BF - B - 1, LANES), jnp.float32)
    o_ref[...] = jnp.concatenate([rows_h, rows_cz, row_nce, pad], axis=0)


# ----------------------------------------------------------------------------
# Wrapper-side parameter/layout transforms (weight-only plumbing, done once)
# ----------------------------------------------------------------------------
def _conv_band_matrix(w, b, L):
    """Dense (L*C, L*K) matrix equivalent to Conv1d(ks=3, stride=1, pad=1) on a
    length-L signal laid out as column index l*C + c (output: l*K + k)."""
    K, C, ks = w.shape
    lp = jnp.arange(L)[:, None]                    # input position
    lo = jnp.arange(L)[None, :]                    # output position
    t = lp - lo + PADDING                          # tap index
    valid = (t >= 0) & (t < ks)
    t_c = jnp.clip(t, 0, ks - 1)
    w_tck = jnp.transpose(w, (2, 1, 0))            # (ks, C, K)
    band = jnp.where(valid[:, :, None, None], w_tck[t_c], 0.0)   # (L, L, C, K)
    band = jnp.transpose(band, (0, 2, 1, 3)).reshape(L * C, L * K)
    bias = jnp.tile(b, (L,)).reshape(1, L * K)     # bias[l*K + k] = b[k]
    return band, bias


def _branch_weight_entries(enc, L, prefix):
    K, E = NUM_KERNELS, EMBEDDING_DIM
    conv_layers = ([(enc["conv_in_w"], enc["conv_in_b"])]
                   + list(enc["conv_hidden"])
                   + [(enc["conv_out_w"], enc["conv_out_b"])])
    entries = []
    for j, (w, b) in enumerate(conv_layers):
        band, cb = _conv_band_matrix(w, b, L)
        entries.append((f"{prefix}_band{j}", band))
        entries.append((f"{prefix}_cb{j}", cb))
    # PyTorch flattens the frame-encoder output as (k, l) -> k*L + l; our
    # activation columns are l*K + k, so permute the linear weight rows, then
    # store it transposed so the kernel contracts without a transpose.
    lin_w = enc["lin_w"].reshape(K, L, E).transpose(1, 0, 2).reshape(L * K, E)
    entries.append((f"{prefix}_linwT", lin_w.T))            # (E, L*K)
    entries.append((f"{prefix}_linb", enc["lin_b"].reshape(1, E)))
    return entries


def _lstm_dest_cols(branch):
    """Fused gate layout: [i_T i_F f_T f_F o_T o_F | g_T g_F] (sigmoids 0:6H,
    tanh 6H:8H).  Source gate order is PyTorch's (i, f, g, o)."""
    H = CONTEXT_DIM
    d_i = np.arange(H) + branch * H
    d_f = np.arange(H) + 2 * H + branch * H
    d_g = np.arange(H) + 6 * H + branch * H
    d_o = np.arange(H) + 4 * H + branch * H
    return np.concatenate([d_i, d_f, d_g, d_o])


def _fused_lstm_entries(ar_T, ar_F):
    H, E = CONTEXT_DIM, EMBEDDING_DIM
    dT, dF = _lstm_dest_cols(0), _lstm_dest_cols(1)
    wih_T = jnp.zeros((E, 8 * H), jnp.float32).at[:, dT].set(ar_T["w_ih"])
    wih_F = jnp.zeros((E, 8 * H), jnp.float32).at[:, dF].set(ar_F["w_ih"])
    whh = jnp.zeros((2 * H, 8 * H), jnp.float32)
    whh = whh.at[0:H, dT].set(ar_T["w_hh"]).at[H:2 * H, dF].set(ar_F["w_hh"])
    b = jnp.zeros((1, 8 * H), jnp.float32)
    b = b.at[0, dT].set(ar_T["b"]).at[0, dF].set(ar_F["b"])
    return [("wih_T", wih_T), ("wih_F", wih_F), ("whh", whh), ("lstm_b", b)]


def _fused_proj_entries(proj_T, proj_F):
    H = CONTEXT_DIM
    h2, h4 = H // 2, H // 4
    pw1 = jnp.zeros((2 * H, 2 * h2), jnp.float32)
    pw1 = pw1.at[0:H, 0:h2].set(proj_T["w1"]).at[H:, h2:].set(proj_F["w1"])
    pw2 = jnp.zeros((2 * h2, 2 * h4), jnp.float32)
    pw2 = pw2.at[0:h2, 0:h4].set(proj_T["w2"]).at[h2:, h4:].set(proj_F["w2"])
    cat = lambda a, b: jnp.concatenate([a.reshape(1, -1), b.reshape(1, -1)], 1)
    return [("pw1", pw1), ("pb1", cat(proj_T["b1"], proj_F["b1"])),
            ("gamma", cat(proj_T["gamma"], proj_F["gamma"])),
            ("beta", cat(proj_T["beta"], proj_F["beta"])),
            ("pw2", pw2), ("pb2", cat(proj_T["b2"], proj_F["b2"]))]


def _fused_wk_entries(wk_tf, wk_ft):
    H, E, kf = CONTEXT_DIM, EMBEDDING_DIM, K_FUTURE
    stack = lambda wk: jnp.transpose(wk["w"], (1, 0, 2)).reshape(H, kf * E)
    w = jnp.zeros((2 * H, 2 * kf * E), jnp.float32)
    w = w.at[0:H, 0:kf * E].set(stack(wk_tf)).at[H:, kf * E:].set(stack(wk_ft))
    b = jnp.concatenate([wk_tf["b"].reshape(1, kf * E),
                         wk_ft["b"].reshape(1, kf * E)], axis=1)
    return [("wk", w), ("wkb", b)]


def _selection_matrices():
    """One-hot row-selection matrices (time-major) for past / future frames."""
    past_rows = [b * NUM_FRAMES + t for t in range(K_PAST) for b in range(BATCH)]
    fut_rows = [b * NUM_FRAMES + (K_PAST + k)
                for k in range(K_FUTURE) for b in range(BATCH)]
    s_past = jax.nn.one_hot(jnp.array(past_rows), BATCH * NUM_FRAMES,
                            dtype=jnp.float32)
    s_fut = jax.nn.one_hot(jnp.array(fut_rows), BATCH * NUM_FRAMES,
                           dtype=jnp.float32)
    return s_past, s_fut


def _build_weight_slab(params):
    s_past, s_fut = _selection_matrices()
    entries = (_branch_weight_entries(params["enc_T"], FRAME_SIZE, "T")
               + _branch_weight_entries(params["enc_F"], FREQ_FRAME_SIZE, "F")
               + [("s_past", s_past), ("s_fut", s_fut)]
               + _fused_lstm_entries(params["ar_T"], params["ar_F"])
               + _fused_proj_entries(params["proj_T"], params["proj_F"])
               + _fused_wk_entries(params["wk_TtoF"], params["wk_FtoT"]))
    slab = jnp.zeros((_W_ROWS, LANES), jnp.float32)
    for name, arr in entries:
        arr = jnp.asarray(arr, jnp.float32)
        r0 = _OFF[name]
        slab = slab.at[r0:r0 + arr.shape[0], 0:arr.shape[1]].set(arr)
    return slab


def _build_x_slab(x_T, x_F):
    B, F = BATCH, NUM_FRAMES
    xT = jnp.transpose(x_T, (0, 2, 3, 1)).reshape(B * F, LC_T)
    xF = jnp.transpose(x_F, (0, 2, 3, 1)).reshape(B * F, LC_F)
    slab = jnp.zeros((2 * B * F, LANES), jnp.float32)
    slab = slab.at[0:B * F, 0:LC_T].set(xT)
    slab = slab.at[B * F:, 0:LC_F].set(xF)
    return slab


def cdpcc_forward(params, x_T, x_F):
    B, F, E, H = BATCH, NUM_FRAMES, EMBEDDING_DIM, CONTEXT_DIM
    x_slab = _build_x_slab(x_T, x_F)
    w_slab = _build_weight_slab(params)

    vmem = pl.BlockSpec(memory_space=pltpu.MemorySpace.VMEM)
    out = pl.pallas_call(
        _cdpcc_kernel,
        out_shape=jax.ShapeDtypeStruct((OUT_ROWS, LANES), jnp.float32),
        in_specs=[vmem, vmem],
        out_specs=vmem,
    )(x_slab, w_slab)

    h_T = out[0:B * F, 0:E].reshape(B, F, E)
    h_F = out[0:B * F, E:2 * E].reshape(B, F, E)
    c_T = out[R_C:R_C + B, 0:H]
    c_F = out[R_C:R_C + B, H:2 * H]
    z_T = out[R_C:R_C + B, 2 * H:2 * H + H // 4]
    z_F = out[R_C:R_C + B, 2 * H + H // 4:2 * H + H // 2]
    return h_T, h_F, c_T, c_F, z_T, z_F, out[R_NCE, 0], out[R_NCE, 1]


# ----------------------------------------------------------------------------
# Parameter init (deterministic, synthetic, PyTorch-style layouts)
# ----------------------------------------------------------------------------
def _randn(key, shape, scale=0.1):
    return jax.random.normal(key, shape, dtype=jnp.float32) * scale


def init_base_encoder(key, in_channels, frame_len):
    ks = jax.random.split(key, 8)
    lin_in = NUM_KERNELS * frame_len   # stride=1, pad=1, ks=3 keeps length
    return {
        "conv_in_w": _randn(ks[0], (NUM_KERNELS, in_channels, KERNEL_SIZE)),
        "conv_in_b": _randn(ks[1], (NUM_KERNELS,)),
        "conv_hidden": [(_randn(ks[2], (NUM_KERNELS, NUM_KERNELS, KERNEL_SIZE)),
                         _randn(ks[3], (NUM_KERNELS,)))
                        for _ in range(NUM_CONV_LAYERS)],
        "conv_out_w": _randn(ks[4], (NUM_KERNELS, NUM_KERNELS, KERNEL_SIZE)),
        "conv_out_b": _randn(ks[5], (NUM_KERNELS,)),
        "lin_w": _randn(ks[6], (lin_in, EMBEDDING_DIM)),
        "lin_b": _randn(ks[7], (EMBEDDING_DIM,)),
    }


def init_lstm(key):
    ks = jax.random.split(key, 3)
    return {
        "w_ih": _randn(ks[0], (EMBEDDING_DIM, 4 * CONTEXT_DIM)),
        "w_hh": _randn(ks[1], (CONTEXT_DIM, 4 * CONTEXT_DIM)),
        "b": _randn(ks[2], (4 * CONTEXT_DIM,)),   # b_ih + b_hh combined
    }


def init_proj_head(key):
    ks = jax.random.split(key, 4)
    h2, h4 = CONTEXT_DIM // 2, CONTEXT_DIM // 4
    return {
        "w1": _randn(ks[0], (CONTEXT_DIM, h2)),
        "b1": _randn(ks[1], (1, h2)),
        "gamma": jnp.ones((1, h2), jnp.float32),
        "beta": jnp.zeros((1, h2), jnp.float32),
        "w2": _randn(ks[2], (h2, h4)),
        "b2": _randn(ks[3], (1, h4)),
    }


def init_wk(key):
    ks = jax.random.split(key, 2)
    return {
        "w": _randn(ks[0], (K_FUTURE, CONTEXT_DIM, EMBEDDING_DIM)),
        "b": _randn(ks[1], (K_FUTURE, 1, EMBEDDING_DIM)),
    }


def init_params(key):
    ks = jax.random.split(key, 8)
    return {
        "enc_T": init_base_encoder(ks[0], INPUT_VARIABLES, FRAME_SIZE),
        "enc_F": init_base_encoder(ks[1], INPUT_VARIABLES, FREQ_FRAME_SIZE),
        "ar_T": init_lstm(ks[2]),
        "ar_F": init_lstm(ks[3]),
        "proj_T": init_proj_head(ks[4]),
        "proj_F": init_proj_head(ks[5]),
        "wk_TtoF": init_wk(ks[6]),
        "wk_FtoT": init_wk(ks[7]),
    }


# ----------------------------------------------------------------------------
# Pure-JAX reference (no Pallas) for numerical verification
# ----------------------------------------------------------------------------
def _conv1d_relu_ref(x, w, b):
    N, C, L = x.shape
    K, _, ks = w.shape
    xp = jnp.pad(x, ((0, 0), (0, 0), (PADDING, PADDING)))
    cols = jnp.stack([xp[:, :, t:t + L] for t in range(ks)], axis=-1)   # (N,C,L,ks)
    y = jnp.einsum("nclt,kct->nkl", cols, w, precision=_HI) + b[None, :, None]
    return jnp.maximum(y, 0.0)


def _base_encoder_ref(x, p):
    B, C, F, L = x.shape
    xf = jnp.transpose(x, (0, 2, 1, 3)).reshape(B * F, C, L)
    y = _conv1d_relu_ref(xf, p["conv_in_w"], p["conv_in_b"])
    for hw, hb in p["conv_hidden"]:
        y = _conv1d_relu_ref(y, hw, hb)
    y = _conv1d_relu_ref(y, p["conv_out_w"], p["conv_out_b"])
    flat = y.reshape(B * F, -1)                       # (k, l) row-major flatten
    h = jnp.dot(flat, p["lin_w"], precision=_HI) + p["lin_b"]
    return h.reshape(B, F, EMBEDDING_DIM)


def _lstm_ref(x_seq, w_ih, w_hh, b):
    B, T, _ = x_seq.shape
    H = w_hh.shape[0]
    h = jnp.zeros((B, H), jnp.float32)
    c = jnp.zeros((B, H), jnp.float32)
    for t in range(T):
        g = (jnp.dot(x_seq[:, t, :], w_ih, precision=_HI)
             + jnp.dot(h, w_hh, precision=_HI) + b)
        i = jax.nn.sigmoid(g[:, :H])
        f = jax.nn.sigmoid(g[:, H:2 * H])
        gg = jnp.tanh(g[:, 2 * H:3 * H])
        o = jax.nn.sigmoid(g[:, 3 * H:])
        c = f * c + i * gg
        h = o * jnp.tanh(c)
    return h


def _proj_ref(x, p):
    h = jnp.dot(x, p["w1"], precision=_HI) + p["b1"]
    mean = jnp.mean(h, axis=0, keepdims=True)
    var = jnp.mean((h - mean) ** 2, axis=0, keepdims=True)
    h = (h - mean) * jax.lax.rsqrt(var + BN_EPS) * p["gamma"] + p["beta"]
    h = jnp.maximum(h, 0.0)
    return jnp.dot(h, p["w2"], precision=_HI) + p["b2"]


def _nce_ref(fut, c, wk):
    kf, B, _ = fut.shape
    acc = 0.0
    for k in range(kf):
        pred = jnp.dot(c, wk["w"][k], precision=_HI) + wk["b"][k]
        scores = jnp.dot(fut[k], pred.T, precision=_HI)
        acc = acc + jnp.sum(jnp.diag(jax.nn.log_softmax(scores, axis=-1)))
    return acc / (-1.0 * B * kf)


def cdpcc_reference(params, x_T, x_F):
    h_T = _base_encoder_ref(x_T, params["enc_T"])
    h_F = _base_encoder_ref(x_F, params["enc_F"])
    fut_T = jnp.transpose(h_T[:, -K_FUTURE:, :], (1, 0, 2))
    fut_F = jnp.transpose(h_F[:, -K_FUTURE:, :], (1, 0, 2))
    c_T = _lstm_ref(h_T[:, :K_PAST, :], params["ar_T"]["w_ih"],
                    params["ar_T"]["w_hh"], params["ar_T"]["b"])
    c_F = _lstm_ref(h_F[:, :K_PAST, :], params["ar_F"]["w_ih"],
                    params["ar_F"]["w_hh"], params["ar_F"]["b"])
    ntf = _nce_ref(fut_F, c_T, params["wk_TtoF"])
    nft = _nce_ref(fut_T, c_F, params["wk_FtoT"])
    z_T = _proj_ref(c_T, params["proj_T"])
    z_F = _proj_ref(c_F, params["proj_F"])
    return h_T, h_F, c_T, c_F, z_T, z_F, ntf, nft


# ----------------------------------------------------------------------------
# Main
# ----------------------------------------------------------------------------
if __name__ == "__main__":
    key = jax.random.PRNGKey(0)
    k_params, k_xt, k_xf = jax.random.split(key, 3)

    params = init_params(k_params)
    x_T = jax.random.normal(k_xt, (BATCH, INPUT_VARIABLES, NUM_FRAMES, FRAME_SIZE),
                            dtype=jnp.float32)
    x_F = jax.random.normal(k_xf, (BATCH, INPUT_VARIABLES, NUM_FRAMES,
                                   FREQ_FRAME_SIZE), dtype=jnp.float32)

    outs = jax.jit(cdpcc_forward)(params, x_T, x_F)
    outs = jax.block_until_ready(outs)
    h_T, h_F, c_T, c_F, z_T, z_F, nce_TtoF, nce_FtoT = outs

    assert h_T.shape == (BATCH, NUM_FRAMES, EMBEDDING_DIM)
    assert h_F.shape == (BATCH, NUM_FRAMES, EMBEDDING_DIM)
    assert c_T.shape == (BATCH, CONTEXT_DIM) and c_F.shape == (BATCH, CONTEXT_DIM)
    assert z_T.shape == (BATCH, CONTEXT_DIM // 4)
    assert z_F.shape == (BATCH, CONTEXT_DIM // 4)
    assert bool(jnp.isfinite(nce_TtoF)) and bool(jnp.isfinite(nce_FtoT))

    # numerical check against a pure-JAX reference of the PyTorch semantics
    ref = cdpcc_reference(params, x_T, x_F)
    names = ("h_T", "h_F", "c_T", "c_F", "z_T", "z_F", "nce_TtoF", "nce_FtoT")
    for name, got, want in zip(names, outs, ref):
        ok = bool(jnp.allclose(got, want, atol=2e-3, rtol=2e-3))
        assert ok, (name,
                    float(jnp.max(jnp.abs(jnp.asarray(got) - jnp.asarray(want)))))

    print("KERNEL_OK")
</pallas_src>

<mosaic_0001>
module attributes {stable_mosaic.version = 11 : i64} {
  func.func @_cdpcc_kernel(%arg0: memref<32x128xf32, #tpu.memory_space<vmem>>, %arg1: memref<816x128xf32, #tpu.memory_space<vmem>>, %arg2: memref<24x128xf32, #tpu.memory_space<vmem>>) attributes {dimension_semantics = [], scalar_prefetch = 0 : i64, scratch_operands = 0 : i64, tpu.core_type = #tpu.core_type<tc>} {
    %c0 = arith.constant 0 : index
    %c0_0 = arith.constant 0 : index
    %0 = vector.load %arg0[%c0, %c0_0] : memref<32x128xf32, #tpu.memory_space<vmem>>, vector<16x64xf32>
    %c0_1 = arith.constant 0 : index
    %c0_2 = arith.constant 0 : index
    %1 = vector.load %arg1[%c0_1, %c0_2] : memref<816x128xf32, #tpu.memory_space<vmem>>, vector<64x128xf32>
    %c320 = arith.constant 320 : index
    %c0_3 = arith.constant 0 : index
    %2 = vector.load %arg1[%c320, %c0_3] : memref<816x128xf32, #tpu.memory_space<vmem>>, vector<1x128xf32>
    %cst = arith.constant dense<0.000000e+00> : vector<16x128xf32>
    %3 = tpu.matmul %0, %1, %cst {dimension_numbers = #tpu.dot_dimension_numbers<[1], [0], [0], [1], [0, 0, 1, 1], [], []>} : vector<16x64xf32>, vector<64x128xf32>, vector<16x128xf32> -> vector<16x128xf32>
    %4 = vector.broadcast %2 : vector<1x128xf32> to vector<16x128xf32>
    %5 = arith.addf %3, %4 : vector<16x128xf32>
    %cst_4 = arith.constant 0.000000e+00 : f32
    %6 = vector.broadcast %cst_4 : f32 to vector<16x128xf32>
    %7 = arith.maximumf %5, %6 : vector<16x128xf32>
    %c64 = arith.constant 64 : index
    %c0_5 = arith.constant 0 : index
    %8 = vector.load %arg1[%c64, %c0_5] : memref<816x128xf32, #tpu.memory_space<vmem>>, vector<128x128xf32>
    %c328 = arith.constant 328 : index
    %c0_6 = arith.constant 0 : index
    %9 = vector.load %arg1[%c328, %c0_6] : memref<816x128xf32, #tpu.memory_space<vmem>>, vector<1x128xf32>
    %cst_7 = arith.constant dense<0.000000e+00> : vector<16x128xf32>
    %10 = tpu.matmul %7, %8, %cst_7 {dimension_numbers = #tpu.dot_dimension_numbers<[1], [0], [0], [1], [0, 0, 1, 1], [], []>} : vector<16x128xf32>, vector<128x128xf32>, vector<16x128xf32> -> vector<16x128xf32>
    %11 = vector.broadcast %9 : vector<1x128xf32> to vector<16x128xf32>
    %12 = arith.addf %10, %11 : vector<16x128xf32>
    %cst_8 = arith.constant 0.000000e+00 : f32
    %13 = vector.broadcast %cst_8 : f32 to vector<16x128xf32>
    %14 = arith.maximumf %12, %13 : vector<16x128xf32>
    %c192 = arith.constant 192 : index
    %c0_9 = arith.constant 0 : index
    %15 = vector.load %arg1[%c192, %c0_9] : memref<816x128xf32, #tpu.memory_space<vmem>>, vector<128x128xf32>
    %c336 = arith.constant 336 : index
    %c0_10 = arith.constant 0 : index
    %16 = vector.load %arg1[%c336, %c0_10] : memref<816x128xf32, #tpu.memory_space<vmem>>, vector<1x128xf32>
    %cst_11 = arith.constant dense<0.000000e+00> : vector<16x128xf32>
    %17 = tpu.matmul %14, %15, %cst_11 {dimension_numbers = #tpu.dot_dimension_numbers<[1], [0], [0], [1], [0, 0, 1, 1], [], []>} : vector<16x128xf32>, vector<128x128xf32>, vector<16x128xf32> -> vector<16x128xf32>
    %18 = vector.broadcast %16 : vector<1x128xf32> to vector<16x128xf32>
    %19 = arith.addf %17, %18 : vector<16x128xf32>
    %cst_12 = arith.constant 0.000000e+00 : f32
    %20 = vector.broadcast %cst_12 : f32 to vector<16x128xf32>
    %21 = arith.maximumf %19, %20 : vector<16x128xf32>
    %c344 = arith.constant 344 : index
    %c0_13 = arith.constant 0 : index
    %22 = vector.load %arg1[%c344, %c0_13] : memref<816x128xf32, #tpu.memory_space<vmem>>, vector<16x128xf32>
    %c360 = arith.constant 360 : index
    %c0_14 = arith.constant 0 : index
    %23 = vector.load %arg1[%c360, %c0_14] : memref<816x128xf32, #tpu.memory_space<vmem>>, vector<1x16xf32>
    %cst_15 = arith.constant dense<0.000000e+00> : vector<16x16xf32>
    %24 = tpu.matmul %21, %22, %cst_15 {dimension_numbers = #tpu.dot_dimension_numbers<[1], [1], [0], [0], [0, 0, 1, 0], [], []>} : vector<16x128xf32>, vector<16x128xf32>, vector<16x16xf32> -> vector<16x16xf32>
    %25 = vector.broadcast %23 : vector<1x16xf32> to vector<16x16xf32>
    %26 = arith.addf %24, %25 : vector<16x16xf32>
    %c16 = arith.constant 16 : index
    %c0_16 = arith.constant 0 : index
    %27 = vector.load %arg0[%c16, %c0_16] : memref<32x128xf32, #tpu.memory_space<vmem>>, vector<16x36xf32>
    %c368 = arith.constant 368 : index
    %c0_17 = arith.constant 0 : index
    %28 = vector.load %arg1[%c368, %c0_17] : memref<816x128xf32, #tpu.memory_space<vmem>>, vector<36x72xf32>
    %c552 = arith.constant 552 : index
    %c0_18 = arith.constant 0 : index
    %29 = vector.load %arg1[%c552, %c0_18] : memref<816x128xf32, #tpu.memory_space<vmem>>, vector<1x72xf32>
    %cst_19 = arith.constant dense<0.000000e+00> : vector<16x72xf32>
    %30 = tpu.matmul %27, %28, %cst_19 {dimension_numbers = #tpu.dot_dimension_numbers<[1], [0], [0], [1], [0, 0, 1, 1], [], []>} : vector<16x36xf32>, vector<36x72xf32>, vector<16x72xf32> -> vector<16x72xf32>
    %31 = vector.broadcast %29 : vector<1x72xf32> to vector<16x72xf32>
    %32 = arith.addf %30, %31 : vector<16x72xf32>
    %cst_20 = arith.constant 0.000000e+00 : f32
    %33 = vector.broadcast %cst_20 : f32 to vector<16x72xf32>
    %34 = arith.maximumf %32, %33 : vector<16x72xf32>
    %c408 = arith.constant 408 : index
    %c0_21 = arith.constant 0 : index
    %35 = vector.load %arg1[%c408, %c0_21] : memref<816x128xf32, #tpu.memory_space<vmem>>, vector<72x72xf32>
    %c560 = arith.constant 560 : index
    %c0_22 = arith.constant 0 : index
    %36 = vector.load %arg1[%c560, %c0_22] : memref<816x128xf32, #tpu.memory_space<vmem>>, vector<1x72xf32>
    %cst_23 = arith.constant dense<0.000000e+00> : vector<16x72xf32>
    %37 = tpu.matmul %34, %35, %cst_23 {dimension_numbers = #tpu.dot_dimension_numbers<[1], [0], [0], [1], [0, 0, 1, 1], [], []>} : vector<16x72xf32>, vector<72x72xf32>, vector<16x72xf32> -> vector<16x72xf32>
    %38 = vector.broadcast %36 : vector<1x72xf32> to vector<16x72xf32>
    %39 = arith.addf %37, %38 : vector<16x72xf32>
    %cst_24 = arith.constant 0.000000e+00 : f32
    %40 = vector.broadcast %cst_24 : f32 to vector<16x72xf32>
    %41 = arith.maximumf %39, %40 : vector<16x72xf32>
    %c480 = arith.constant 480 : index
    %c0_25 = arith.constant 0 : index
    %42 = vector.load %arg1[%c480, %c0_25] : memref<816x128xf32, #tpu.memory_space<vmem>>, vector<72x72xf32>
    %c568 = arith.constant 568 : index
    %c0_26 = arith.constant 0 : index
    %43 = vector.load %arg1[%c568, %c0_26] : memref<816x128xf32, #tpu.memory_space<vmem>>, vector<1x72xf32>
    %cst_27 = arith.constant dense<0.000000e+00> : vector<16x72xf32>
    %44 = tpu.matmul %41, %42, %cst_27 {dimension_numbers = #tpu.dot_dimension_numbers<[1], [0], [0], [1], [0, 0, 1, 1], [], []>} : vector<16x72xf32>, vector<72x72xf32>, vector<16x72xf32> -> vector<16x72xf32>
    %45 = vector.broadcast %43 : vector<1x72xf32> to vector<16x72xf32>
    %46 = arith.addf %44, %45 : vector<16x72xf32>
    %cst_28 = arith.constant 0.000000e+00 : f32
    %47 = vector.broadcast %cst_28 : f32 to vector<16x72xf32>
    %48 = arith.maximumf %46, %47 : vector<16x72xf32>
    %c576 = arith.constant 576 : index
    %c0_29 = arith.constant 0 : index
    %49 = vector.load %arg1[%c576, %c0_29] : memref<816x128xf32, #tpu.memory_space<vmem>>, vector<16x72xf32>
    %c592 = arith.constant 592 : index
    %c0_30 = arith.constant 0 : index
    %50 = vector.load %arg1[%c592, %c0_30] : memref<816x128xf32, #tpu.memory_space<vmem>>, vector<1x16xf32>
    %cst_31 = arith.constant dense<0.000000e+00> : vector<16x16xf32>
    %51 = tpu.matmul %48, %49, %cst_31 {dimension_numbers = #tpu.dot_dimension_numbers<[1], [1], [0], [0], [0, 0, 1, 0], [], []>} : vector<16x72xf32>, vector<16x72xf32>, vector<16x16xf32> -> vector<16x16xf32>
    %52 = vector.broadcast %50 : vector<1x16xf32> to vector<16x16xf32>
    %53 = arith.addf %51, %52 : vector<16x16xf32>
    %c600 = arith.constant 600 : index
    %c0_32 = arith.constant 0 : index
    %54 = vector.load %arg1[%c600, %c0_32] : memref<816x128xf32, #tpu.memory_space<vmem>>, vector<10x16xf32>
    %c616 = arith.constant 616 : index
    %c0_33 = arith.constant 0 : index
    %55 = vector.load %arg1[%c616, %c0_33] : memref<816x128xf32, #tpu.memory_space<vmem>>, vector<6x16xf32>
    %cst_34 = arith.constant dense<0.000000e+00> : vector<10x16xf32>
    %56 = tpu.matmul %54, %26, %cst_34 {dimension_numbers = #tpu.dot_dimension_numbers<[1], [0], [0], [1], [0, 0, 1, 1], [], []>} : vector<10x16xf32>, vector<16x16xf32>, vector<10x16xf32> -> vector<10x16xf32>
    %cst_35 = arith.constant dense<0.000000e+00> : vector<10x16xf32>
    %57 = tpu.matmul %54, %53, %cst_35 {dimension_numbers = #tpu.dot_dimension_numbers<[1], [0], [0], [1], [0, 0, 1, 1], [], []>} : vector<10x16xf32>, vector<16x16xf32>, vector<10x16xf32> -> vector<10x16xf32>
    %cst_36 = arith.constant dense<0.000000e+00> : vector<6x16xf32>
    %58 = tpu.matmul %55, %26, %cst_36 {dimension_numbers = #tpu.dot_dimension_numbers<[1], [0], [0], [1], [0, 0, 1, 1], [], []>} : vector<6x16xf32>, vector<16x16xf32>, vector<6x16xf32> -> vector<6x16xf32>
    %cst_37 = arith.constant dense<0.000000e+00> : vector<6x16xf32>
    %59 = tpu.matmul %55, %53, %cst_37 {dimension_numbers = #tpu.dot_dimension_numbers<[1], [0], [0], [1], [0, 0, 1, 1], [], []>} : vector<6x16xf32>, vector<16x16xf32>, vector<6x16xf32> -> vector<6x16xf32>
    %c624 = arith.constant 624 : index
    %c0_38 = arith.constant 0 : index
    %60 = vector.load %arg1[%c624, %c0_38] : memref<816x128xf32, #tpu.memory_space<vmem>>, vector<16x128xf32>
    %c640 = arith.constant 640 : index
    %c0_39 = arith.constant 0 : index
    %61 = vector.load %arg1[%c640, %c0_39] : memref<816x128xf32, #tpu.memory_space<vmem>>, vector<16x128xf32>
    %c656 = arith.constant 656 : index
    %c0_40 = arith.constant 0 : index
    %62 = vector.load %arg1[%c656, %c0_40] : memref<816x128xf32, #tpu.memory_space<vmem>>, vector<32x128xf32>
    %c688 = arith.constant 688 : index
    %c0_41 = arith.constant 0 : index
    %63 = vector.load %arg1[%c688, %c0_41] : memref<816x128xf32, #tpu.memory_space<vmem>>, vector<1x128xf32>
    %cst_42 = arith.constant dense<0.000000e+00> : vector<10x128xf32>
    %64 = tpu.matmul %56, %60, %cst_42 {dimension_numbers = #tpu.dot_dimension_numbers<[1], [0], [0], [1], [0, 0, 1, 1], [], []>} : vector<10x16xf32>, vector<16x128xf32>, vector<10x128xf32> -> vector<10x128xf32>
    %cst_43 = arith.constant dense<0.000000e+00> : vector<10x128xf32>
    %65 = tpu.matmul %57, %61, %cst_43 {dimension_numbers = #tpu.dot_dimension_numbers<[1], [0], [0], [1], [0, 0, 1, 1], [], []>} : vector<10x16xf32>, vector<16x128xf32>, vector<10x128xf32> -> vector<10x128xf32>
    %66 = arith.addf %64, %65 : vector<10x128xf32>
    %67 = vector.broadcast %63 : vector<1x128xf32> to vector<10x128xf32>
    %68 = arith.addf %66, %67 : vector<10x128xf32>
    %cst_44 = arith.constant 0.000000e+00 : f32
    %69 = vector.broadcast %cst_44 : f32 to vector<2x32xf32>
    %cst_45 = arith.constant 0.000000e+00 : f32
    %70 = vector.broadcast %cst_45 : f32 to vector<2x32xf32>
    %71 = vector.extract_strided_slice %68 {offsets = [0, 0], sizes = [2, 128], strides = [1, 1]} : vector<10x128xf32> to vector<2x128xf32>
    %cst_46 = arith.constant dense<0.000000e+00> : vector<2x128xf32>
    %72 = tpu.matmul %69, %62, %cst_46 {dimension_numbers = #tpu.dot_dimension_numbers<[1], [0], [0], [1], [0, 0, 1, 1], [], []>} : vector<2x32xf32>, vector<32x128xf32>, vector<2x128xf32> -> vector<2x128xf32>
    %73 = arith.addf %71, %72 : vector<2x128xf32>
    %74 = vector.extract_strided_slice %73 {offsets = [0, 0], sizes = [2, 96], strides = [1, 1]} : vector<2x128xf32> to vector<2x96xf32>
    %75 = arith.negf %74 : vector<2x96xf32>
    %76 = math.exp %75 : vector<2x96xf32>
    %cst_47 = arith.constant 1.000000e+00 : f32
    %77 = vector.broadcast %cst_47 : f32 to vector<2x96xf32>
    %78 = arith.addf %77, %76 : vector<2x96xf32>
    %79 = arith.divf %77, %78 : vector<2x96xf32>
    %80 = vector.extract_strided_slice %73 {offsets = [0, 96], sizes = [2, 32], strides = [1, 1]} : vector<2x128xf32> to vector<2x32xf32>
    %81 = math.tanh %80 : vector<2x32xf32>
    %82 = vector.extract_strided_slice %79 {offsets = [0, 32], sizes = [2, 32], strides = [1, 1]} : vector<2x96xf32> to vector<2x32xf32>
    %83 = arith.mulf %82, %70 : vector<2x32xf32>
    %84 = vector.extract_strided_slice %79 {offsets = [0, 0], sizes = [2, 32], strides = [1, 1]} : vector<2x96xf32> to vector<2x32xf32>
    %85 = arith.mulf %84, %81 : vector<2x32xf32>
    %86 = arith.addf %83, %85 : vector<2x32xf32>
    %87 = vector.extract_strided_slice %79 {offsets = [0, 64], sizes = [2, 32], strides = [1, 1]} : vector<2x96xf32> to vector<2x32xf32>
    %88 = math.tanh %86 : vector<2x32xf32>
    %89 = arith.mulf %87, %88 : vector<2x32xf32>
    %90 = vector.extract_strided_slice %68 {offsets = [2, 0], sizes = [2, 128], strides = [1, 1]} : vector<10x128xf32> to vector<2x128xf32>
    %cst_48 = arith.constant dense<0.000000e+00> : vector<2x128xf32>
    %91 = tpu.matmul %89, %62, %cst_48 {dimension_numbers = #tpu.dot_dimension_numbers<[1], [0], [0], [1], [0, 0, 1, 1], [], []>} : vector<2x32xf32>, vector<32x128xf32>, vector<2x128xf32> -> vector<2x128xf32>
    %92 = arith.addf %90, %91 : vector<2x128xf32>
    %93 = vector.extract_strided_slice %92 {offsets = [0, 0], sizes = [2, 96], strides = [1, 1]} : vector<2x128xf32> to vector<2x96xf32>
    %94 = arith.negf %93 : vector<2x96xf32>
    %95 = math.exp %94 : vector<2x96xf32>
    %cst_49 = arith.constant 1.000000e+00 : f32
    %96 = vector.broadcast %cst_49 : f32 to vector<2x96xf32>
    %97 = arith.addf %96, %95 : vector<2x96xf32>
    %98 = arith.divf %96, %97 : vector<2x96xf32>
    %99 = vector.extract_strided_slice %92 {offsets = [0, 96], sizes = [2, 32], strides = [1, 1]} : vector<2x128xf32> to vector<2x32xf32>
    %100 = math.tanh %99 : vector<2x32xf32>
    %101 = vector.extract_strided_slice %98 {offsets = [0, 32], sizes = [2, 32], strides = [1, 1]} : vector<2x96xf32> to vector<2x32xf32>
    %102 = arith.mulf %101, %86 : vector<2x32xf32>
    %103 = vector.extract_strided_slice %98 {offsets = [0, 0], sizes = [2, 32], strides = [1, 1]} : vector<2x96xf32> to vector<2x32xf32>
    %104 = arith.mulf %103, %100 : vector<2x32xf32>
    %105 = arith.addf %102, %104 : vector<2x32xf32>
    %106 = vector.extract_strided_slice %98 {offsets = [0, 64], sizes = [2, 32], strides = [1, 1]} : vector<2x96xf32> to vector<2x32xf32>
    %107 = math.tanh %105 : vector<2x32xf32>
    %108 = arith.mulf %106, %107 : vector<2x32xf32>
    %109 = vector.extract_strided_slice %68 {offsets = [4, 0], sizes = [2, 128], strides = [1, 1]} : vector<10x128xf32> to vector<2x128xf32>
    %cst_50 = arith.constant dense<0.000000e+00> : vector<2x128xf32>
    %110 = tpu.matmul %108, %62, %cst_50 {dimension_numbers = #tpu.dot_dimension_numbers<[1], [0], [0], [1], [0, 0, 1, 1], [], []>} : vector<2x32xf32>, vector<32x128xf32>, vector<2x128xf32> -> vector<2x128xf32>
    %111 = arith.addf %109, %110 : vector<2x128xf32>
    %112 = vector.extract_strided_slice %111 {offsets = [0, 0], sizes = [2, 96], strides = [1, 1]} : vector<2x128xf32> to vector<2x96xf32>
    %113 = arith.negf %112 : vector<2x96xf32>
    %114 = math.exp %113 : vector<2x96xf32>
    %cst_51 = arith.constant 1.000000e+00 : f32
    %115 = vector.broadcast %cst_51 : f32 to vector<2x96xf32>
    %116 = arith.addf %115, %114 : vector<2x96xf32>
    %117 = arith.divf %115, %116 : vector<2x96xf32>
    %118 = vector.extract_strided_slice %111 {offsets = [0, 96], sizes = [2, 32], strides = [1, 1]} : vector<2x128xf32> to vector<2x32xf32>
    %119 = math.tanh %118 : vector<2x32xf32>
    %120 = vector.extract_strided_slice %117 {offsets = [0, 32], sizes = [2, 32], strides = [1, 1]} : vector<2x96xf32> to vector<2x32xf32>
    %121 = arith.mulf %120, %105 : vector<2x32xf32>
    %122 = vector.extract_strided_slice %117 {offsets = [0, 0], sizes = [2, 32], strides = [1, 1]} : vector<2x96xf32> to vector<2x32xf32>
    %123 = arith.mulf %122, %119 : vector<2x32xf32>
    %124 = arith.addf %121, %123 : vector<2x32xf32>
    %125 = vector.extract_strided_slice %117 {offsets = [0, 64], sizes = [2, 32], strides = [1, 1]} : vector<2x96xf32> to vector<2x32xf32>
    %126 = math.tanh %124 : vector<2x32xf32>
    %127 = arith.mulf %125, %126 : vector<2x32xf32>
    %128 = vector.extract_strided_slice %68 {offsets = [6, 0], sizes = [2, 128], strides = [1, 1]} : vector<10x128xf32> to vector<2x128xf32>
    %cst_52 = arith.constant dense<0.000000e+00> : vector<2x128xf32>
    %129 = tpu.matmul %127, %62, %cst_52 {dimension_numbers = #tpu.dot_dimension_numbers<[1], [0], [0], [1], [0, 0, 1, 1], [], []>} : vector<2x32xf32>, vector<32x128xf32>, vector<2x128xf32> -> vector<2x128xf32>
    %130 = arith.addf %128, %129 : vector<2x128xf32>
    %131 = vector.extract_strided_slice %130 {offsets = [0, 0], sizes = [2, 96], strides = [1, 1]} : vector<2x128xf32> to vector<2x96xf32>
    %132 = arith.negf %131 : vector<2x96xf32>
    %133 = math.exp %132 : vector<2x96xf32>
    %cst_53 = arith.constant 1.000000e+00 : f32
    %134 = vector.broadcast %cst_53 : f32 to vector<2x96xf32>
    %135 = arith.addf %134, %133 : vector<2x96xf32>
    %136 = arith.divf %134, %135 : vector<2x96xf32>
    %137 = vector.extract_strided_slice %130 {offsets = [0, 96], sizes = [2, 32], strides = [1, 1]} : vector<2x128xf32> to vector<2x32xf32>
    %138 = math.tanh %137 : vector<2x32xf32>
    %139 = vector.extract_strided_slice %136 {offsets = [0, 32], sizes = [2, 32], strides = [1, 1]} : vector<2x96xf32> to vector<2x32xf32>
    %140 = arith.mulf %139, %124 : vector<2x32xf32>
    %141 = vector.extract_strided_slice %136 {offsets = [0, 0], sizes = [2, 32], strides = [1, 1]} : vector<2x96xf32> to vector<2x32xf32>
    %142 = arith.mulf %141, %138 : vector<2x32xf32>
    %143 = arith.addf %140, %142 : vector<2x32xf32>
    %144 = vector.extract_strided_slice %136 {offsets = [0, 64], sizes = [2, 32], strides = [1, 1]} : vector<2x96xf32> to vector<2x32xf32>
    %145 = math.tanh %143 : vector<2x32xf32>
    %146 = arith.mulf %144, %145 : vector<2x32xf32>
    %147 = vector.extract_strided_slice %68 {offsets = [8, 0], sizes = [2, 128], strides = [1, 1]} : vector<10x128xf32> to vector<2x128xf32>
    %cst_54 = arith.constant dense<0.000000e+00> : vector<2x128xf32>
    %148 = tpu.matmul %146, %62, %cst_54 {dimension_numbers = #tpu.dot_dimension_numbers<[1], [0], [0], [1], [0, 0, 1, 1], [], []>} : vector<2x32xf32>, vector<32x128xf32>, vector<2x128xf32> -> vector<2x128xf32>
    %149 = arith.addf %147, %148 : vector<2x128xf32>
    %150 = vector.extract_strided_slice %149 {offsets = [0, 0], sizes = [2, 96], strides = [1, 1]} : vector<2x128xf32> to vector<2x96xf32>
    %151 = arith.negf %150 : vector<2x96xf32>
    %152 = math.exp %151 : vector<2x96xf32>
    %cst_55 = arith.constant 1.000000e+00 : f32
    %153 = vector.broadcast %cst_55 : f32 to vector<2x96xf32>
    %154 = arith.addf %153, %152 : vector<2x96xf32>
    %155 = arith.divf %153, %154 : vector<2x96xf32>
    %156 = vector.extract_strided_slice %149 {offsets = [0, 96], sizes = [2, 32], strides = [1, 1]} : vector<2x128xf32> to vector<2x32xf32>
    %157 = math.tanh %156 : vector<2x32xf32>
    %158 = vector.extract_strided_slice %155 {offsets = [0, 32], sizes = [2, 32], strides = [1, 1]} : vector<2x96xf32> to vector<2x32xf32>
    %159 = arith.mulf %158, %143 : vector<2x32xf32>
    %160 = vector.extract_strided_slice %155 {offsets = [0, 0], sizes = [2, 32], strides = [1, 1]} : vector<2x96xf32> to vector<2x32xf32>
    %161 = arith.mulf %160, %157 : vector<2x32xf32>
    %162 = arith.addf %159, %161 : vector<2x32xf32>
    %163 = vector.extract_strided_slice %155 {offsets = [0, 64], sizes = [2, 32], strides = [1, 1]} : vector<2x96xf32> to vector<2x32xf32>
    %164 = math.tanh %162 : vector<2x32xf32>
    %165 = arith.mulf %163, %164 : vector<2x32xf32>
    %c696 = arith.constant 696 : index
    %c0_56 = arith.constant 0 : index
    %166 = vector.load %arg1[%c696, %c0_56] : memref<816x128xf32, #tpu.memory_space<vmem>>, vector<32x16xf32>
    %cst_57 = arith.constant dense<0.000000e+00> : vector<2x16xf32>
    %167 = tpu.matmul %165, %166, %cst_57 {dimension_numbers = #tpu.dot_dimension_numbers<[1], [0], [0], [1], [0, 0, 1, 1], [], []>} : vector<2x32xf32>, vector<32x16xf32>, vector<2x16xf32> -> vector<2x16xf32>
    %c728 = arith.constant 728 : index
    %c0_58 = arith.constant 0 : index
    %168 = vector.load %arg1[%c728, %c0_58] : memref<816x128xf32, #tpu.memory_space<vmem>>, vector<1x16xf32>
    %169 = vector.broadcast %168 : vector<1x16xf32> to vector<2x16xf32>
    %170 = arith.addf %167, %169 : vector<2x16xf32>
    %cst_59 = arith.constant dense<0.000000e+00> : vector<16xf32>
    %171 = vector.multi_reduction <add>, %170, %cst_59 [0] : vector<2x16xf32> to vector<16xf32>
    %172 = vector.shape_cast %171 : vector<16xf32> to vector<1x16xf32>
    %cst_60 = arith.constant 2.000000e+00 : f32
    %173 = vector.broadcast %cst_60 : f32 to vector<1x16xf32>
    %174 = arith.divf %172, %173 : vector<1x16xf32>
    %175 = vector.broadcast %174 : vector<1x16xf32> to vector<2x16xf32>
    %176 = arith.subf %170, %175 : vector<2x16xf32>
    %177 = arith.mulf %176, %176 : vector<2x16xf32>
    %cst_61 = arith.constant dense<0.000000e+00> : vector<16xf32>
    %178 = vector.multi_reduction <add>, %177, %cst_61 [0] : vector<2x16xf32> to vector<16xf32>
    %179 = vector.shape_cast %178 : vector<16xf32> to vector<1x16xf32>
    %cst_62 = arith.constant 2.000000e+00 : f32
    %180 = vector.broadcast %cst_62 : f32 to vector<1x16xf32>
    %181 = arith.divf %179, %180 : vector<1x16xf32>
    %182 = vector.broadcast %174 : vector<1x16xf32> to vector<2x16xf32>
    %183 = arith.subf %170, %182 : vector<2x16xf32>
    %cst_63 = arith.constant 9.99999974E-6 : f32
    %184 = vector.broadcast %cst_63 : f32 to vector<1x16xf32>
    %185 = arith.addf %181, %184 : vector<1x16xf32>
    %186 = math.rsqrt %185 : vector<1x16xf32>
    %187 = vector.broadcast %186 : vector<1x16xf32> to vector<2x16xf32>
    %188 = arith.mulf %183, %187 : vector<2x16xf32>
    %c736 = arith.constant 736 : index
    %c0_64 = arith.constant 0 : index
    %189 = vector.load %arg1[%c736, %c0_64] : memref<816x128xf32, #tpu.memory_space<vmem>>, vector<1x16xf32>
    %190 = vector.broadcast %189 : vector<1x16xf32> to vector<2x16xf32>
    %191 = arith.mulf %188, %190 : vector<2x16xf32>
    %c744 = arith.constant 744 : index
    %c0_65 = arith.constant 0 : index
    %192 = vector.load %arg1[%c744, %c0_65] : memref<816x128xf32, #tpu.memory_space<vmem>>, vector<1x16xf32>
    %193 = vector.broadcast %192 : vector<1x16xf32> to vector<2x16xf32>
    %194 = arith.addf %191, %193 : vector<2x16xf32>
    %cst_66 = arith.constant 0.000000e+00 : f32
    %195 = vector.broadcast %cst_66 : f32 to vector<2x16xf32>
    %196 = arith.maximumf %194, %195 : vector<2x16xf32>
    %c752 = arith.constant 752 : index
    %c0_67 = arith.constant 0 : index
    %197 = vector.load %arg1[%c752, %c0_67] : memref<816x128xf32, #tpu.memory_space<vmem>>, vector<16x8xf32>
    %cst_68 = arith.constant dense<0.000000e+00> : vector<2x8xf32>
    %198 = tpu.matmul %196, %197, %cst_68 {dimension_numbers = #tpu.dot_dimension_numbers<[1], [0], [0], [1], [0, 0, 1, 1], [], []>} : vector<2x16xf32>, vector<16x8xf32>, vector<2x8xf32> -> vector<2x8xf32>
    %c768 = arith.constant 768 : index
    %c0_69 = arith.constant 0 : index
    %199 = vector.load %arg1[%c768, %c0_69] : memref<816x128xf32, #tpu.memory_space<vmem>>, vector<1x8xf32>
    %200 = vector.broadcast %199 : vector<1x8xf32> to vector<2x8xf32>
    %201 = arith.addf %198, %200 : vector<2x8xf32>
    %c776 = arith.constant 776 : index
    %c0_70 = arith.constant 0 : index
    %202 = vector.load %arg1[%c776, %c0_70] : memref<816x128xf32, #tpu.memory_space<vmem>>, vector<32x96xf32>
    %cst_71 = arith.constant dense<0.000000e+00> : vector<2x96xf32>
    %203 = tpu.matmul %165, %202, %cst_71 {dimension_numbers = #tpu.dot_dimension_numbers<[1], [0], [0], [1], [0, 0, 1, 1], [], []>} : vector<2x32xf32>, vector<32x96xf32>, vector<2x96xf32> -> vector<2x96xf32>
    %c808 = arith.constant 808 : index
    %c0_72 = arith.constant 0 : index
    %204 = vector.load %arg1[%c808, %c0_72] : memref<816x128xf32, #tpu.memory_space<vmem>>, vector<1x96xf32>
    %205 = vector.broadcast %204 : vector<1x96xf32> to vector<2x96xf32>
    %206 = arith.addf %203, %205 : vector<2x96xf32>
    %207 = tpu.iota {dimensions = array<i32: 0>} : vector<2x2xi32>
    %208 = tpu.iota {dimensions = array<i32: 1>} : vector<2x2xi32>
    %209 = arith.cmpi eq, %207, %208 : vector<2x2xi32>
    %210 = vector.extract_strided_slice %206 {offsets = [0, 0], sizes = [2, 16], strides = [1, 1]} : vector<2x96xf32> to vector<2x16xf32>
    %211 = vector.extract_strided_slice %59 {offsets = [0, 0], sizes = [2, 16], strides = [1, 1]} : vector<6x16xf32> to vector<2x16xf32>
    %cst_73 = arith.constant dense<0.000000e+00> : vector<2x2xf32>
    %212 = tpu.matmul %211, %210, %cst_73 {dimension_numbers = #tpu.dot_dimension_numbers<[1], [1], [0], [0], [0, 0, 1, 0], [], []>} : vector<2x16xf32>, vector<2x16xf32>, vector<2x2xf32> -> vector<2x2xf32>
    %cst_74 = arith.constant dense<0xFF800000> : vector<2xf32>
    %213 = vector.multi_reduction <maximumf>, %212, %cst_74 [1] : vector<2x2xf32> to vector<2xf32>
    %214 = vector.shape_cast %213 : vector<2xf32> to vector<2x1xf32>
    %215 = vector.broadcast %214 : vector<2x1xf32> to vector<2x2xf32>
    %216 = arith.subf %212, %215 : vector<2x2xf32>
    %217 = math.exp %216 : vector<2x2xf32>
    %cst_75 = arith.constant dense<0.000000e+00> : vector<2xf32>
    %218 = vector.multi_reduction <add>, %217, %cst_75 [1] : vector<2x2xf32> to vector<2xf32>
    %219 = vector.shape_cast %218 : vector<2xf32> to vector<2x1xf32>
    %220 = math.log %219 : vector<2x1xf32>
    %221 = arith.addf %214, %220 : vector<2x1xf32>
    %222 = vector.broadcast %221 : vector<2x1xf32> to vector<2x2xf32>
    %223 = arith.subf %212, %222 : vector<2x2xf32>
    %cst_76 = arith.constant 0.000000e+00 : f32
    %224 = vector.broadcast %cst_76 : f32 to vector<2x2xf32>
    %225 = arith.select %209, %223, %224 : vector<2x2xi1>, vector<2x2xf32>
    %226 = vector.shape_cast %225 : vector<2x2xf32> to vector<1x2x2xf32>
    %cst_77 = arith.constant dense<0.000000e+00> : vector<1xf32>
    %227 = vector.multi_reduction <add>, %226, %cst_77 [1, 2] : vector<1x2x2xf32> to vector<1xf32>
    %228 = vector.shape_cast %227 : vector<1xf32> to vector<1x1x1xf32>
    %229 = vector.extract %228[0, 0, 0] : f32 from vector<1x1x1xf32>
    %cst_78 = arith.constant 0.000000e+00 : f32
    %230 = arith.addf %cst_78, %229 : f32
    %231 = vector.extract_strided_slice %206 {offsets = [0, 16], sizes = [2, 16], strides = [1, 1]} : vector<2x96xf32> to vector<2x16xf32>
    %232 = vector.extract_strided_slice %59 {offsets = [2, 0], sizes = [2, 16], strides = [1, 1]} : vector<6x16xf32> to vector<2x16xf32>
    %cst_79 = arith.constant dense<0.000000e+00> : vector<2x2xf32>
    %233 = tpu.matmul %232, %231, %cst_79 {dimension_numbers = #tpu.dot_dimension_numbers<[1], [1], [0], [0], [0, 0, 1, 0], [], []>} : vector<2x16xf32>, vector<2x16xf32>, vector<2x2xf32> -> vector<2x2xf32>
    %cst_80 = arith.constant dense<0xFF800000> : vector<2xf32>
    %234 = vector.multi_reduction <maximumf>, %233, %cst_80 [1] : vector<2x2xf32> to vector<2xf32>
    %235 = vector.shape_cast %234 : vector<2xf32> to vector<2x1xf32>
    %236 = vector.broadcast %235 : vector<2x1xf32> to vector<2x2xf32>
    %237 = arith.subf %233, %236 : vector<2x2xf32>
    %238 = math.exp %237 : vector<2x2xf32>
    %cst_81 = arith.constant dense<0.000000e+00> : vector<2xf32>
    %239 = vector.multi_reduction <add>, %238, %cst_81 [1] : vector<2x2xf32> to vector<2xf32>
    %240 = vector.shape_cast %239 : vector<2xf32> to vector<2x1xf32>
    %241 = math.log %240 : vector<2x1xf32>
    %242 = arith.addf %235, %241 : vector<2x1xf32>
    %243 = vector.broadcast %242 : vector<2x1xf32> to vector<2x2xf32>
    %244 = arith.subf %233, %243 : vector<2x2xf32>
    %cst_82 = arith.constant 0.000000e+00 : f32
    %245 = vector.broadcast %cst_82 : f32 to vector<2x2xf32>
    %246 = arith.select %209, %244, %245 : vector<2x2xi1>, vector<2x2xf32>
    %247 = vector.shape_cast %246 : vector<2x2xf32> to vector<1x2x2xf32>
    %cst_83 = arith.constant dense<0.000000e+00> : vector<1xf32>
    %248 = vector.multi_reduction <add>, %247, %cst_83 [1, 2] : vector<1x2x2xf32> to vector<1xf32>
    %249 = vector.shape_cast %248 : vector<1xf32> to vector<1x1x1xf32>
    %250 = vector.extract %249[0, 0, 0] : f32 from vector<1x1x1xf32>
    %251 = arith.addf %230, %250 : f32
    %252 = vector.extract_strided_slice %206 {offsets = [0, 32], sizes = [2, 16], strides = [1, 1]} : vector<2x96xf32> to vector<2x16xf32>
    %253 = vector.extract_strided_slice %59 {offsets = [4, 0], sizes = [2, 16], strides = [1, 1]} : vector<6x16xf32> to vector<2x16xf32>
    %cst_84 = arith.constant dense<0.000000e+00> : vector<2x2xf32>
    %254 = tpu.matmul %253, %252, %cst_84 {dimension_numbers = #tpu.dot_dimension_numbers<[1], [1], [0], [0], [0, 0, 1, 0], [], []>} : vector<2x16xf32>, vector<2x16xf32>, vector<2x2xf32> -> vector<2x2xf32>
    %cst_85 = arith.constant dense<0xFF800000> : vector<2xf32>
    %255 = vector.multi_reduction <maximumf>, %254, %cst_85 [1] : vector<2x2xf32> to vector<2xf32>
    %256 = vector.shape_cast %255 : vector<2xf32> to vector<2x1xf32>
    %257 = vector.broadcast %256 : vector<2x1xf32> to vector<2x2xf32>
    %258 = arith.subf %254, %257 : vector<2x2xf32>
    %259 = math.exp %258 : vector<2x2xf32>
    %cst_86 = arith.constant dense<0.000000e+00> : vector<2xf32>
    %260 = vector.multi_reduction <add>, %259, %cst_86 [1] : vector<2x2xf32> to vector<2xf32>
    %261 = vector.shape_cast %260 : vector<2xf32> to vector<2x1xf32>
    %262 = math.log %261 : vector<2x1xf32>
    %263 = arith.addf %256, %262 : vector<2x1xf32>
    %264 = vector.broadcast %263 : vector<2x1xf32> to vector<2x2xf32>
    %265 = arith.subf %254, %264 : vector<2x2xf32>
    %cst_87 = arith.constant 0.000000e+00 : f32
    %266 = vector.broadcast %cst_87 : f32 to vector<2x2xf32>
    %267 = arith.select %209, %265, %266 : vector<2x2xi1>, vector<2x2xf32>
    %268 = vector.shape_cast %267 : vector<2x2xf32> to vector<1x2x2xf32>
    %cst_88 = arith.constant dense<0.000000e+00> : vector<1xf32>
    %269 = vector.multi_reduction <add>, %268, %cst_88 [1, 2] : vector<1x2x2xf32> to vector<1xf32>
    %270 = vector.shape_cast %269 : vector<1xf32> to vector<1x1x1xf32>
    %271 = vector.extract %270[0, 0, 0] : f32 from vector<1x1x1xf32>
    %272 = arith.addf %251, %271 : f32
    %cst_89 = arith.constant -6.000000e+00 : f32
    %273 = arith.divf %272, %cst_89 : f32
    %274 = vector.extract_strided_slice %206 {offsets = [0, 48], sizes = [2, 16], strides = [1, 1]} : vector<2x96xf32> to vector<2x16xf32>
    %275 = vector.extract_strided_slice %58 {offsets = [0, 0], sizes = [2, 16], strides = [1, 1]} : vector<6x16xf32> to vector<2x16xf32>
    %cst_90 = arith.constant dense<0.000000e+00> : vector<2x2xf32>
    %276 = tpu.matmul %275, %274, %cst_90 {dimension_numbers = #tpu.dot_dimension_numbers<[1], [1], [0], [0], [0, 0, 1, 0], [], []>} : vector<2x16xf32>, vector<2x16xf32>, vector<2x2xf32> -> vector<2x2xf32>
    %cst_91 = arith.constant dense<0xFF800000> : vector<2xf32>
    %277 = vector.multi_reduction <maximumf>, %276, %cst_91 [1] : vector<2x2xf32> to vector<2xf32>
    %278 = vector.shape_cast %277 : vector<2xf32> to vector<2x1xf32>
    %279 = vector.broadcast %278 : vector<2x1xf32> to vector<2x2xf32>
    %280 = arith.subf %276, %279 : vector<2x2xf32>
    %281 = math.exp %280 : vector<2x2xf32>
    %cst_92 = arith.constant dense<0.000000e+00> : vector<2xf32>
    %282 = vector.multi_reduction <add>, %281, %cst_92 [1] : vector<2x2xf32> to vector<2xf32>
    %283 = vector.shape_cast %282 : vector<2xf32> to vector<2x1xf32>
    %284 = math.log %283 : vector<2x1xf32>
    %285 = arith.addf %278, %284 : vector<2x1xf32>
    %286 = vector.broadcast %285 : vector<2x1xf32> to vector<2x2xf32>
    %287 = arith.subf %276, %286 : vector<2x2xf32>
    %cst_93 = arith.constant 0.000000e+00 : f32
    %288 = vector.broadcast %cst_93 : f32 to vector<2x2xf32>
    %289 = arith.select %209, %287, %288 : vector<2x2xi1>, vector<2x2xf32>
    %290 = vector.shape_cast %289 : vector<2x2xf32> to vector<1x2x2xf32>
    %cst_94 = arith.constant dense<0.000000e+00> : vector<1xf32>
    %291 = vector.multi_reduction <add>, %290, %cst_94 [1, 2] : vector<1x2x2xf32> to vector<1xf32>
    %292 = vector.shape_cast %291 : vector<1xf32> to vector<1x1x1xf32>
    %293 = vector.extract %292[0, 0, 0] : f32 from vector<1x1x1xf32>
    %cst_95 = arith.constant 0.000000e+00 : f32
    %294 = arith.addf %cst_95, %293 : f32
    %295 = vector.extract_strided_slice %206 {offsets = [0, 64], sizes = [2, 16], strides = [1, 1]} : vector<2x96xf32> to vector<2x16xf32>
    %296 = vector.extract_strided_slice %58 {offsets = [2, 0], sizes = [2, 16], strides = [1, 1]} : vector<6x16xf32> to vector<2x16xf32>
    %cst_96 = arith.constant dense<0.000000e+00> : vector<2x2xf32>
    %297 = tpu.matmul %296, %295, %cst_96 {dimension_numbers = #tpu.dot_dimension_numbers<[1], [1], [0], [0], [0, 0, 1, 0], [], []>} : vector<2x16xf32>, vector<2x16xf32>, vector<2x2xf32> -> vector<2x2xf32>
    %cst_97 = arith.constant dense<0xFF800000> : vector<2xf32>
    %298 = vector.multi_reduction <maximumf>, %297, %cst_97 [1] : vector<2x2xf32> to vector<2xf32>
    %299 = vector.shape_cast %298 : vector<2xf32> to vector<2x1xf32>
    %300 = vector.broadcast %299 : vector<2x1xf32> to vector<2x2xf32>
    %301 = arith.subf %297, %300 : vector<2x2xf32>
    %302 = math.exp %301 : vector<2x2xf32>
    %cst_98 = arith.constant dense<0.000000e+00> : vector<2xf32>
    %303 = vector.multi_reduction <add>, %302, %cst_98 [1] : vector<2x2xf32> to vector<2xf32>
    %304 = vector.shape_cast %303 : vector<2xf32> to vector<2x1xf32>
    %305 = math.log %304 : vector<2x1xf32>
    %306 = arith.addf %299, %305 : vector<2x1xf32>
    %307 = vector.broadcast %306 : vector<2x1xf32> to vector<2x2xf32>
    %308 = arith.subf %297, %307 : vector<2x2xf32>
    %cst_99 = arith.constant 0.000000e+00 : f32
    %309 = vector.broadcast %cst_99 : f32 to vector<2x2xf32>
    %310 = arith.select %209, %308, %309 : vector<2x2xi1>, vector<2x2xf32>
    %311 = vector.shape_cast %310 : vector<2x2xf32> to vector<1x2x2xf32>
    %cst_100 = arith.constant dense<0.000000e+00> : vector<1xf32>
    %312 = vector.multi_reduction <add>, %311, %cst_100 [1, 2] : vector<1x2x2xf32> to vector<1xf32>
    %313 = vector.shape_cast %312 : vector<1xf32> to vector<1x1x1xf32>
    %314 = vector.extract %313[0, 0, 0] : f32 from vector<1x1x1xf32>
    %315 = arith.addf %294, %314 : f32
    %316 = vector.extract_strided_slice %206 {offsets = [0, 80], sizes = [2, 16], strides = [1, 1]} : vector<2x96xf32> to vector<2x16xf32>
    %317 = vector.extract_strided_slice %58 {offsets = [4, 0], sizes = [2, 16], strides = [1, 1]} : vector<6x16xf32> to vector<2x16xf32>
    %cst_101 = arith.constant dense<0.000000e+00> : vector<2x2xf32>
    %318 = tpu.matmul %317, %316, %cst_101 {dimension_numbers = #tpu.dot_dimension_numbers<[1], [1], [0], [0], [0, 0, 1, 0], [], []>} : vector<2x16xf32>, vector<2x16xf32>, vector<2x2xf32> -> vector<2x2xf32>
    %cst_102 = arith.constant dense<0xFF800000> : vector<2xf32>
    %319 = vector.multi_reduction <maximumf>, %318, %cst_102 [1] : vector<2x2xf32> to vector<2xf32>
    %320 = vector.shape_cast %319 : vector<2xf32> to vector<2x1xf32>
    %321 = vector.broadcast %320 : vector<2x1xf32> to vector<2x2xf32>
    %322 = arith.subf %318, %321 : vector<2x2xf32>
    %323 = math.exp %322 : vector<2x2xf32>
    %cst_103 = arith.constant dense<0.000000e+00> : vector<2xf32>
    %324 = vector.multi_reduction <add>, %323, %cst_103 [1] : vector<2x2xf32> to vector<2xf32>
    %325 = vector.shape_cast %324 : vector<2xf32> to vector<2x1xf32>
    %326 = math.log %325 : vector<2x1xf32>
    %327 = arith.addf %320, %326 : vector<2x1xf32>
    %328 = vector.broadcast %327 : vector<2x1xf32> to vector<2x2xf32>
    %329 = arith.subf %318, %328 : vector<2x2xf32>
    %cst_104 = arith.constant 0.000000e+00 : f32
    %330 = vector.broadcast %cst_104 : f32 to vector<2x2xf32>
    %331 = arith.select %209, %329, %330 : vector<2x2xi1>, vector<2x2xf32>
    %332 = vector.shape_cast %331 : vector<2x2xf32> to vector<1x2x2xf32>
    %cst_105 = arith.constant dense<0.000000e+00> : vector<1xf32>
    %333 = vector.multi_reduction <add>, %332, %cst_105 [1, 2] : vector<1x2x2xf32> to vector<1xf32>
    %334 = vector.shape_cast %333 : vector<1xf32> to vector<1x1x1xf32>
    %335 = vector.extract %334[0, 0, 0] : f32 from vector<1x1x1xf32>
    %336 = arith.addf %315, %335 : f32
    %cst_106 = arith.constant -6.000000e+00 : f32
    %337 = arith.divf %336, %cst_106 : f32
    %cst_107 = arith.constant 0.000000e+00 : f32
    %338 = vector.broadcast %cst_107 : f32 to vector<16x96xf32>
    %339 = tpu.concatenate %26, %53, %338 in 1 : vector<16x16xf32>, vector<16x16xf32>, vector<16x96xf32> -> vector<16x128xf32>
    %cst_108 = arith.constant 0.000000e+00 : f32
    %340 = vector.broadcast %cst_108 : f32 to vector<2x88xf32>
    %341 = tpu.concatenate %165, %201, %340 in 1 : vector<2x32xf32>, vector<2x8xf32>, vector<2x88xf32> -> vector<2x128xf32>
    %342 = tpu.iota {dimensions = array<i32: 1>} : vector<1x128xi32>
    %c0_i32 = arith.constant 0 : i32
    %343 = vector.broadcast %c0_i32 : i32 to vector<1x128xi32>
    %344 = arith.cmpi eq, %342, %343 : vector<1x128xi32>
    %c1_i32 = arith.constant 1 : i32
    %345 = vector.broadcast %c1_i32 : i32 to vector<1x128xi32>
    %346 = arith.cmpi eq, %342, %345 : vector<1x128xi32>
    %cst_109 = arith.constant 0.000000e+00 : f32
    %347 = vector.broadcast %337 : f32 to vector<1x128xf32>
    %348 = vector.broadcast %cst_109 : f32 to vector<1x128xf32>
    %349 = arith.select %346, %347, %348 : vector<1x128xi1>, vector<1x128xf32>
    %350 = vector.broadcast %273 : f32 to vector<1x128xf32>
    %351 = arith.select %344, %350, %349 : vector<1x128xi1>, vector<1x128xf32>
    %cst_110 = arith.constant 0.000000e+00 : f32
    %352 = vector.broadcast %cst_110 : f32 to vector<5x128xf32>
    %353 = tpu.concatenate %339, %341, %351, %352 in 0 : vector<16x128xf32>, vector<2x128xf32>, vector<1x128xf32>, vector<5x128xf32> -> vector<24x128xf32>
    %c0_111 = arith.constant 0 : index
    %c0_112 = arith.constant 0 : index
    %354 = vector.load %arg2[%c0_111, %c0_112] : memref<24x128xf32, #tpu.memory_space<vmem>>, vector<24x128xf32>
    tpu.vector_store %arg2[%c0_111, %c0_112], %353 {strides = array<i32>} : memref<24x128xf32, #tpu.memory_space<vmem>>, vector<24x128xf32>,
    return
  }
}

</mosaic_0001>

<bundles_post_ra>
// kernel: tile.33
= control target key start
LH: loop header
LB: loop body
LE: loop exit
PB: predicated region body
PF: predicated region fallthrough
CT: control target
= control target key end

     0   :  { %s28_s0 = inlined_call_operand.vmem [shape: f32[8], index: 0, kind: input, shape index: {}]   ;;  %s29_s1 = inlined_call_operand.vmem [shape: f32[16,8], index: 1, kind: output, shape index: {}]  }
   0x1   :  { %v4_v0 = vld [vmem:[%s28_s0] ss:$0 sm:$0xff] }
   0x2   :  { %5 = vst [vmem:[%s29_s1] sm:$0xff] %v4_v0  ;;  %8 = vst [vmem:[%s29_s1 + $0x8] sm:$0xff] %v4_v0 }

// kernel: tile.48
= control target key start
LH: loop header
LB: loop body
LE: loop exit
PB: predicated region body
PF: predicated region fallthrough
CT: control target
= control target key end

     0   :  { %s28_s0 = inlined_call_operand.vmem [shape: f32[8], index: 0, kind: input, shape index: {}]   ;;  %s29_s1 = inlined_call_operand.vmem [shape: f32[9,8], index: 1, kind: output, shape index: {}]  }
   0x1   :  { %v4_v0 = vld [vmem:[%s28_s0] ss:$0 sm:$0xff] }
   0x2   :  { %5 = vst [vmem:[%s29_s1] sm:$0xff] %v4_v0  ;;  %8 = vst [vmem:[%s29_s1 + $0x8] sm:$0xff] %v4_v0 }

// kernel: cdpcc_forward.1
= control target key start
LH: loop header
LB: loop body
LE: loop exit
PB: predicated region body
PF: predicated region fallthrough
CT: control target
= control target key end

     0   :  { %vm26_vm0 = vcmask 523264   ;;  %vm407_vm1 = vcmask 1043456   ;;  %vm400_vm2 = vcmask 293888   ;;  %vm502_vm3 = vcmask 588800   ;;  %s3338_s20 = smov 32   ;;  %s3339_s21 = smov 64   ;;  %s3998_s1 = inlined_call_operand.vmem [shape: f32[816,128], index: 1, kind: input, shape index: {}]   ;;  %s3999_s0 = inlined_call_operand.vmem [shape: f32[32,128], index: 0, kind: input, shape index: {}]   ;;  %s4000_s2 = inlined_call_operand.vmem [shape: f32[24,128], index: 2, kind: output, shape index: {}]  }
   0x1   :  { %v20_v0 = vld [vmem:[%s3998_s1 + $0x38] sm:$0xff]  ;;  %v19_v1 = vld [vmem:[%s3998_s1 + $0x30] sm:$0xff]  ;;  %v18_v2 = vld [vmem:[%s3998_s1 + $0x28] sm:$0xff]  ;;  %vm780_vm4 = vcmask 130048   ;;  %vm3337_vm5 = vmmov 0   ;;  %vm1257_vm6 = vcmask 261120  }
   0x2   :  { %2935 = vmatprep.subr.mxu0 %v20_v0  ;;  %v11_v3 = vld [vmem:[%s3999_s0] sm:$0xff]  ;;  %v125_v4 = vld [vmem:[%s3998_s1 + $0xb8] sm:$0xff]  ;;  %v124_v5 = vld [vmem:[%s3998_s1 + $0xb0] sm:$0xff]  ;;  %vm1864_vm7 = vcmask 123904   ;;  %s3340_s17 = smov 96   ;;  %s3341_s18 = smov 112  }
   0x3   :  { %2936 = vmatpush3.msra.mxu0 %v20_v0  ;;  %2951 = vmatprep.mubr.msk.f32.mxu0 %vm26_vm0, %v11_v3  ;;  %v17_v6 = vld [vmem:[%s3998_s1 + $0x20] sm:$0xff]  ;;  %v123_v7 = vld [vmem:[%s3998_s1 + $0xa8] sm:$0xff]  ;;  %v16_v8 = vld [vmem:[%s3998_s1 + $0x18] sm:$0xff]  ;;  %s3342_s19 = smov 80   ;;  %s3343_s22 = smov 48   ;;  %vm2140_vm8 = vcmask 9216  }
   0x4   :  { %2937 = vmatprep.subr.mxu0 %v19_v1  ;;  %2954 = vmatprep.subr.mxu1 %v125_v4  ;;  %v122_v9 = vld [vmem:[%s3998_s1 + $0xa0] sm:$0xff]  ;;  %v15_v10 = vld [vmem:[%s3998_s1 + $0x10] sm:$0xff]  ;;  %v121_v11 = vld [vmem:[%s3998_s1 + $0x98] sm:$0xff]  ;;  %s3344_s28 = smov 16   ;;  %vm2700_vm11 = vcmask 326656   ;;  %vm2708_vm13 = vcmask 1041408  }
   0x5   :  { %2938 = vmatpush3.msra.mxu0 %v19_v1  ;;  %2955 = vmatpush3.msra.mxu1 %v125_v4  ;;  %v14_v12 = vld [vmem:[%s3998_s1 + $0x8] sm:$0xff]  ;;  %v120_v13 = vld [vmem:[%s3998_s1 + $0x90] sm:$0xff]  ;;  %v13_v14 = vld [vmem:[%s3998_s1] sm:$0xff]  ;;  %vm2710_vm14 = vcmask 1042432  }
   0x6   :  { %2939 = vmatprep.subr.mxu0 %v18_v2  ;;  %2956 = vmatprep.subr.mxu1 %v124_v5  ;;  %v119_v15 = vld [vmem:[%s3998_s1 + $0x88] sm:$0xff]  ;;  %v118_v17 = vld [vmem:[%s3998_s1 + $0x80] sm:$0xff]  ;;  %v117_v18 = vld [vmem:[%s3998_s1 + $0x78] sm:$0xff] }
   0x7   :  { %2940 = vmatpush3.msra.mxu0 %v18_v2  ;;  %2957 = vmatpush3.msra.mxu1 %v124_v5  ;;  %v12_v16 = vld [vmem:[%s3999_s0 + $0x8] sm:$0xff]  ;;  %v116_v19 = vld [vmem:[%s3998_s1 + $0x70] sm:$0xff]  ;;  %v114_v21 = vld [vmem:[%s3998_s1 + $0x60] sm:$0xff] }
   0x8   :  { %2941 = vmatprep.subr.mxu0 %v17_v6  ;;  %2958 = vmatprep.subr.mxu1 %v123_v7  ;;  %v115_v20 = vld [vmem:[%s3998_s1 + $0x68] sm:$0xff]  ;;  %v113_v22 = vld [vmem:[%s3998_s1 + $0x58] sm:$0xff]  ;;  %v112_v23 = vld [vmem:[%s3998_s1 + $0x50] sm:$0xff] }
   0x9   :  { %2942 = vmatpush3.msra.mxu0 %v17_v6  ;;  %2959 = vmatpush3.msra.mxu1 %v123_v7  ;;  %v111_v24 = vld [vmem:[%s3998_s1 + $0x48] sm:$0xff]  ;;  %v110_v25 = vld [vmem:[%s3998_s1 + $0x40] sm:$0xff]  ;;  %v223_v26 = vld [vmem:[%s3998_s1 + $0x138] sm:$0xff] }
   0xa   :  { %2943 = vmatprep.subr.mxu0 %v16_v8  ;;  %2960 = vmatprep.subr.mxu1 %v122_v9  ;;  %v222_v27 = vld [vmem:[%s3998_s1 + $0x130] sm:$0xff]  ;;  %v221_v28 = vld [vmem:[%s3998_s1 + $0x128] sm:$0xff]  ;;  %v220_v29 = vld [vmem:[%s3998_s1 + $0x120] sm:$0xff] }
   0xb   :  { %2944 = vmatpush3.msra.mxu0 %v16_v8  ;;  %2961 = vmatpush3.msra.mxu1 %v122_v9  ;;  %v219_v30 = vld [vmem:[%s3998_s1 + $0x118] sm:$0xff]  ;;  %v218_v31 = vld [vmem:[%s3998_s1 + $0x110] sm:$0xff]  ;;  %v217_v32 = vld [vmem:[%s3998_s1 + $0x108] sm:$0xff] }
   0xc   :  { %2945 = vmatprep.subr.mxu0 %v15_v10  ;;  %2962 = vmatprep.subr.mxu1 %v121_v11  ;;  %v216_v33 = vld [vmem:[%s3998_s1 + $0x100] sm:$0xff]  ;;  %v215_v34 = vld [vmem:[%s3998_s1 + $0xf8] sm:$0xff]  ;;  %v214_v35 = vld [vmem:[%s3998_s1 + $0xf0] sm:$0xff] }
   0xd   :  { %2946 = vmatpush3.msra.mxu0 %v15_v10  ;;  %2963 = vmatpush3.msra.mxu1 %v121_v11  ;;  %v213_v36 = vld [vmem:[%s3998_s1 + $0xe8] sm:$0xff]  ;;  %v212_v37 = vld [vmem:[%s3998_s1 + $0xe0] sm:$0xff]  ;;  %v211_v45 = vld [vmem:[%s3998_s1 + $0xd8] sm:$0xff] }
   0xe   :  { %2947 = vmatprep.subr.mxu0 %v14_v12  ;;  %2964 = vmatprep.subr.mxu1 %v120_v13  ;;  %v2719_v38 = vld [vmem:[%s3998_s1 + $0x140] ss:$0 sm:$0xff]  ;;  %v210_v46 = vld [vmem:[%s3998_s1 + $0xd0] sm:$0xff]  ;;  %v209_v47 = vld [vmem:[%s3998_s1 + $0xc8] sm:$0xff] }
   0xf   :  { %2948 = vmatpush3.msra.mxu0 %v14_v12  ;;  %2965 = vmatpush3.msra.mxu1 %v120_v13  ;;  %v208_v48 = vld [vmem:[%s3998_s1 + $0xc0] sm:$0xff]  ;;  %v2722_v50 = vld [vmem:[%s3998_s1 + $0x148] ss:$0 sm:$0xff]  ;;  %v306_v57 = vld [vmem:[%s3998_s1 + $0x158] sm:$0xff] }
  0x10   :  { %2949 = vmatprep.subr.mxu0 %v13_v14  ;;  %2966 = vmatprep.subr.mxu1 %v119_v15  ;;  %v307_v49 = vld [vmem:[%s3998_s1 + $0x160] sm:$0xff]  ;;  %v394_v58 = vld [vmem:[%s3998_s1 + $0x190] sm:$0xf]  ;;  %v496_v59 = vld [vmem:[%s3998_s1 + $0x1d8] sm:$0xff] }
  0x11   :  { %2950 = vmatpush3.msra.mxu0 %v13_v14  ;;  %2967 = vmatpush3.msra.mxu1 %v119_v15  ;;  %v2723_v60 = vld [vmem:[%s3998_s1 + $0x150] ss:$0 sm:$0xff]  ;;  %v393_v4 = vld [vmem:[%s3998_s1 + $0x188] sm:$0xff]  ;;  %v392_v5 = vld [vmem:[%s3998_s1 + $0x180] sm:$0xff] }
  0x12   :  { %2952 = vmatmul.mubr.msk.f32.vlgmr.msra.gmra.mxu0 %vm26_vm0, %v12_v16  ;;  %2968 = vmatprep.subr.mxu1 %v118_v17  ;;  %v388_v3 = vld [vmem:[%s3999_s0 + $0x10] sm:$0xff]  ;;  %v391_v6 = vld [vmem:[%s3998_s1 + $0x178] sm:$0xff]  ;;  %v594_v9 = vld [vmem:[%s3998_s1 + $0x220] sm:$0xff] }
  0x13   :  { %2969 = vmatpush3.msra.mxu1 %v118_v17  ;;  %2989 = vmatprep.subr.mxu0 %v223_v26  ;;  %v390_v7 = vld [vmem:[%s3998_s1 + $0x170] sm:$0xff]  ;;  %v389_v8 = vld [vmem:[%s3999_s0 + $0x18] sm:$0xff]  ;;  %v591_v12 = vld [vmem:[%s3998_s1 + $0x208] sm:$0xff] }
  0x14   :  { %2970 = vmatprep.subr.mxu1 %v117_v18  ;;  %2990 = vmatpush3.msra.mxu0 %v223_v26  ;;  %v593_v10 = vld [vmem:[%s3998_s1 + $0x218] sm:$0xff]  ;;  %v592_v11 = vld [vmem:[%s3998_s1 + $0x210] sm:$0xff]  ;;  %v590_v13 = vld [vmem:[%s3998_s1 + $0x200] sm:$0xff] }
  0x15   :  { %2971 = vmatpush3.msra.mxu1 %v117_v18  ;;  %2991 = vmatprep.subr.mxu0 %v222_v27  ;;  %v589_v14 = vld [vmem:[%s3998_s1 + $0x1f8] sm:$0xff]  ;;  %v588_v15 = vld [vmem:[%s3998_s1 + $0x1f0] sm:$0xff]  ;;  %v587_v16 = vld [vmem:[%s3998_s1 + $0x1e8] sm:$0xff] }
  0x16   :  { %2972 = vmatprep.subr.mxu1 %v116_v19  ;;  %2992 = vmatpush3.msra.mxu0 %v222_v27  ;;  %v495_v17 = vld [vmem:[%s3998_s1 + $0x1d0] sm:$0xff]  ;;  %v586_v18 = vld [vmem:[%s3998_s1 + $0x1e0] sm:$0xff]  ;;  %v2724_v26 = vld [vmem:[%s3998_s1 + $0x168] ss:$0 sm:$0xff] }
  0x17   :  { %2973 = vmatpush3.msra.mxu1 %v116_v19  ;;  %2993 = vmatprep.subr.mxu0 %v221_v28  ;;  %v494_v19 = vld [vmem:[%s3998_s1 + $0x1c8] sm:$0xff] }
  0x18   :  { %2974 = vmatprep.subr.mxu1 %v115_v20  ;;  %2994 = vmatpush3.msra.mxu0 %v221_v28 }
  0x19   :  { %2975 = vmatpush3.msra.mxu1 %v115_v20  ;;  %2995 = vmatprep.subr.mxu0 %v220_v29  ;;  %v493_v20 = vld [vmem:[%s3998_s1 + $0x1c0] sm:$0xff] }
  0x1a   :  { %2976 = vmatprep.subr.mxu1 %v114_v21  ;;  %2996 = vmatpush3.msra.mxu0 %v220_v29 }
  0x1b   :  { %2977 = vmatpush3.msra.mxu1 %v114_v21  ;;  %2997 = vmatprep.subr.mxu0 %v219_v30  ;;  %v492_v21 = vld [vmem:[%s3998_s1 + $0x1b8] sm:$0xff] }
  0x1c   :  { %2978 = vmatprep.subr.mxu1 %v113_v22  ;;  %2998 = vmatpush3.msra.mxu0 %v219_v30 }
  0x1d   :  { %2979 = vmatpush3.msra.mxu1 %v113_v22  ;;  %2999 = vmatprep.subr.mxu0 %v218_v31  ;;  %v491_v22 = vld [vmem:[%s3998_s1 + $0x1b0] sm:$0xff] }
  0x1e   :  { %2980 = vmatprep.subr.mxu1 %v112_v23  ;;  %3000 = vmatpush3.msra.mxu0 %v218_v31  ;;  %v2725_v31 = vld [vmem:[%s3998_s1 + $0x228] ss:$0 sm:$0xff] }
  0x1f   :  { %2981 = vmatpush3.msra.mxu1 %v112_v23  ;;  %3001 = vmatprep.subr.mxu0 %v217_v32  ;;  %v490_v23 = vld [vmem:[%s3998_s1 + $0x1a8] sm:$0xff] }
  0x20   :  { %2982 = vmatprep.subr.mxu1 %v111_v24  ;;  %3002 = vmatpush3.msra.mxu0 %v217_v32 }
  0x21   :  { %2983 = vmatpush3.msra.mxu1 %v111_v24  ;;  %3003 = vmatprep.subr.mxu0 %v216_v33  ;;  %v489_v24 = vld [vmem:[%s3998_s1 + $0x1a0] sm:$0xff] }
  0x22   :  { %2984 = vmatprep.subr.mxu1 %v110_v25  ;;  %3004 = vmatpush3.msra.mxu0 %v216_v33 }
  0x23   :  { %2985 = vmatpush3.msra.mxu1 %v110_v25  ;;  %3005 = vmatprep.subr.mxu0 %v215_v34  ;;  %v488_v25 = vld [vmem:[%s3998_s1 + $0x198] sm:$0xff] }
  0x24   :  { %3006 = vmatpush3.msra.mxu0 %v215_v34  ;;  %3024 = vmatprep.subr.mxu1 %v307_v49 }
  0x25   :  { %3007 = vmatprep.subr.mxu0 %v214_v35 }
  0x26   :  { %3008 = vmatpush3.msra.mxu0 %v214_v35 }
  0x27   :  { %3009 = vmatprep.subr.mxu0 %v213_v36 }
  0x28   :  { %3010 = vmatpush3.msra.mxu0 %v213_v36 }
  0x29   :  { %3011 = vmatprep.subr.mxu0 %v212_v37 }
  0x2a   :  { %3012 = vmatpush3.msra.mxu0 %v212_v37 }
  0x2b   :  { %3013 = vmatprep.subr.mxu0 %v211_v45 }
  0x2c   :  { %3014 = vmatpush3.msra.mxu0 %v211_v45 }
  0x2d   :  { %3015 = vmatprep.subr.mxu0 %v210_v46 }
  0x2e   :  { %3016 = vmatpush3.msra.mxu0 %v210_v46  ;;  %v683_v46 = vld [vmem:[%s3998_s1 + $0x240] sm:$0xff] }
  0x2f   :  { %3017 = vmatprep.subr.mxu0 %v209_v47 }
  0x30   :  { %3018 = vmatpush3.msra.mxu0 %v209_v47  ;;  %v3336_v47 = vmov 0.0  }
  0x31   :  { %3019 = vmatprep.subr.mxu0 %v208_v48 }
  0x32   :  { %3020 = vmatpush3.msra.mxu0 %v208_v48  ;;  %v777_v48 = vld [vmem:[%s3998_s1 + $0x258] sm:$0xff] }
  0x33   :  { %3044 = vmatprep.subr.mxu0 %v496_v59 }
  0xd2   :  { %v2953_v39 = vpop.f32.mrf.mxu0 }
  0xd3   :  { %v105_v40 = vadd.f32 %v2953_v39, %v2719_v38  ;;  %v2729_v39 = vld [vmem:[%s3998_s1 + $0x230] ss:$0 sm:$0xff] }
  0xd4   :  { %v99_v41 = vpop.f32.mrf.mxu0 }
  0xd5   :  { %v100_v42 = vadd.f32 %v2719_v38, %v99_v41  ;;  %v109_v44 = vmax.f32 %v105_v40, 0.0  ;;  %v684_v38 = vld [vmem:[%s3998_s1 + $0x248] sm:$0xff] }
  0xd7   :  { %v108_v43 = vmax.f32 %v100_v42, 0.0 }
  0xd9   :  { %2986 = vmatprep.mubr.f32.mxu1 %v108_v43 }
  0xda   :  { %2987 = vmatmul.mubr.f32.vlgmr.msra.gmra.mxu1 %v109_v44 }
  0xdb   :  { %3025 = vmatpush3.xpose.msra.mxu1 %v307_v49  ;;  %v778_v49 = vld [vmem:[%s3998_s1 + $0x260] sm:$0x3] }
  0xdc   :  { %3026 = vmatprep.subr.mxu1 %v306_v57 }
  0xdf   :  { %3027 = vmatpush3.xpose.msra.mxu1 %v306_v57  ;;  %v779_v57 = vld [vmem:[%s3998_s1 + $0x268] sm:$0x3f] }
  0xe0   :  { %3031 = vmatprep.subr.msk.mxu1 %vm407_vm1, %v394_v58 }
 0x19a   :  { %v2988_v51 = vpop.f32.mrf.mxu1 }
 0x19b   :  { %v203_v52 = vadd.f32 %v2988_v51, %v2722_v50 }
 0x19c   :  { %v197_v53 = vpop.f32.mrf.mxu1 }
 0x19d   :  { %v198_v54 = vadd.f32 %v2722_v50, %v197_v53  ;;  %v207_v56 = vmax.f32 %v203_v52, 0.0  ;;  %v2732_v50 = vld [vmem:[%s3998_s1 + $0x238] ss:$0 sm:$0xff] }
 0x19f   :  { %v206_v55 = vmax.f32 %v198_v54, 0.0 }
 0x1a1   :  { %3021 = vmatprep.mubr.f32.mxu0 %v206_v55 }
 0x1a2   :  { %3022 = vmatmul.mubr.f32.vlgmr.msra.gmra.mxu0 %v207_v56 }
 0x1a3   :  { %3045 = vmatpush3.msra.mxu0 %v496_v59  ;;  %v2735_v59 = vld [vmem:[%s3998_s1 + $0x250] ss:$0 sm:$0xff] }
 0x1a4   :  { %3046 = vmatprep.subr.mxu0 %v495_v17 }
 0x1a5   :  { %3047 = vmatpush3.msra.mxu0 %v495_v17  ;;  %v2750_v17 = vld [vmem:[%s3998_s1 + $0x2b0] ss:$0 sm:$0xff] }
 0x1a6   :  { %3048 = vmatprep.subr.mxu0 %v494_v19 }
 0x1a7   :  { %3049 = vmatpush3.msra.mxu0 %v494_v19 }
 0x1a8   :  { %3050 = vmatprep.subr.mxu0 %v493_v20 }
 0x1a9   :  { %3051 = vmatpush3.msra.mxu0 %v493_v20 }
 0x1aa   :  { %3052 = vmatprep.subr.mxu0 %v492_v21 }
 0x1ab   :  { %3053 = vmatpush3.msra.mxu0 %v492_v21 }
 0x1ac   :  { %3054 = vmatprep.subr.mxu0 %v491_v22 }
 0x1ad   :  { %3055 = vmatpush3.msra.mxu0 %v491_v22 }
 0x1ae   :  { %3056 = vmatprep.subr.mxu0 %v490_v23 }
 0x1af   :  { %3057 = vmatpush3.msra.mxu0 %v490_v23 }
 0x1b0   :  { %3058 = vmatprep.subr.mxu0 %v489_v24 }
 0x1b1   :  { %3059 = vmatpush3.msra.mxu0 %v489_v24 }
 0x1b2   :  { %3060 = vmatprep.subr.mxu0 %v488_v25 }
 0x1b3   :  { %3061 = vmatpush3.msra.mxu0 %v488_v25 }
 0x1b4   :  { %3086 = vmatprep.subr.msk.mxu0 %vm502_vm3, %v684_v38 }
 0x262   :  { %v3023_v61 = vpop.f32.mrf.mxu0 }
 0x263   :  { %v301_v62 = vadd.f32 %v3023_v61, %v2723_v60 }
 0x264   :  { %v295_v63 = vpop.f32.mrf.mxu0 }
 0x265   :  { %v296_v0 = vadd.f32 %v2723_v60, %v295_v63  ;;  %v305_v2 = vmax.f32 %v301_v62, 0.0 }
 0x267   :  { %v304_v1 = vmax.f32 %v296_v0, 0.0 }
 0x269   :  { %3028 = vmatprep.mubr.f32.mxu1 %v304_v1  ;;  %v1081_v1 = vld [vmem:[%s3998_s1 + $0x278] sm:$0xff] }
 0x26a   :  { %3029 = vmatmul.mubr.f32.vlgmr.msra.gmra.mxu1 %v305_v2 }
 0x26b   :  { %3032 = vmatpush3.msk.msra.mxu1 %vm407_vm1, %v394_v58  ;;  %3041 = vmatprep.mubr.msk.f32.mxu1 %vm400_vm2, %v388_v3  ;;  %v1083_v58 = vld [vmem:[%s3998_s1 + $0x288] sm:$0xff]  ;;  %v1080_v3 = vld [vmem:[%s3998_s1 + $0x270] sm:$0xff] }
 0x26c   :  { %3033 = vmatprep.subr.mxu1 %v393_v4 }
 0x26d   :  { %3034 = vmatpush3.msra.mxu1 %v393_v4  ;;  %v1082_v4 = vld [vmem:[%s3998_s1 + $0x280] sm:$0xff] }
 0x26e   :  { %3035 = vmatprep.subr.mxu1 %v392_v5 }
 0x26f   :  { %3036 = vmatpush3.msra.mxu1 %v392_v5  ;;  %v3677_v5 = vld [vmem:[%s3998_s1 + $0x2a8] sm:$0xff] }
 0x270   :  { %3037 = vmatprep.subr.mxu1 %v391_v6 }
 0x271   :  { %3038 = vmatpush3.msra.mxu1 %v391_v6  ;;  %v3683_v6 = vld [vmem:[%s3998_s1 + $0x2a0] sm:$0xff] }
 0x272   :  { %3039 = vmatprep.subr.mxu1 %v390_v7 }
 0x273   :  { %3040 = vmatpush3.msra.mxu1 %v390_v7  ;;  %v3690_v7 = vld [vmem:[%s3998_s1 + $0x298] sm:$0xff] }
 0x274   :  { %3042 = vmatmul.mubr.msk.f32.vlgmr.msra.gmra.mxu1 %vm400_vm2, %v389_v8  ;;  %3065 = vmatprep.subr.mxu1 %v594_v9  ;;  %v3697_v8 = vld [vmem:[%s3998_s1 + $0x290] sm:$0xff] }
 0x275   :  { %3066 = vmatpush3.msra.mxu1 %v594_v9 }
 0x276   :  { %3067 = vmatprep.subr.mxu1 %v593_v10 }
 0x277   :  { %3068 = vmatpush3.msra.mxu1 %v593_v10 }
 0x278   :  { %3069 = vmatprep.subr.mxu1 %v592_v11 }
 0x279   :  { %3070 = vmatpush3.msra.mxu1 %v592_v11 }
 0x27a   :  { %3071 = vmatprep.subr.mxu1 %v591_v12 }
 0x27b   :  { %3072 = vmatpush3.msra.mxu1 %v591_v12 }
 0x27c   :  { %3073 = vmatprep.subr.mxu1 %v590_v13 }
 0x27d   :  { %3074 = vmatpush3.msra.mxu1 %v590_v13 }
 0x27e   :  { %3075 = vmatprep.subr.mxu1 %v589_v14 }
 0x27f   :  { %3076 = vmatpush3.msra.mxu1 %v589_v14 }
 0x280   :  { %3077 = vmatprep.subr.mxu1 %v588_v15 }
 0x281   :  { %3078 = vmatpush3.msra.mxu1 %v588_v15 }
 0x282   :  { %3079 = vmatprep.subr.mxu1 %v587_v16 }
 0x283   :  { %3080 = vmatpush3.msra.mxu1 %v587_v16 }
 0x284   :  { %3081 = vmatprep.subr.mxu1 %v586_v18 }
 0x285   :  { %3082 = vmatpush3.msra.mxu1 %v586_v18 }
 0x32a   :  { %v3030_v27 = vpop.f32.mrf.mxu1 }
 0x32b   :  { %v3585_v28 = vadd.f32 %v3030_v27, %v2724_v26 }
 0x32c   :  { %v379_v29 = vpop.f32.mrf.mxu1 }
 0x32d   :  { %v3587_v30 = vadd.f32 %v2724_v26, %v379_v29  ;;  %3093 = vmatprep.subr.mxu1 %v3585_v28 }
 0x334   :  { %v3043_v32 = vpop.f32.mrf.mxu1 }
 0x335   :  { %v483_v33 = vadd.f32 %v3043_v32, %v2725_v31 }
 0x336   :  { %v477_v34 = vpop.f32.mrf.mxu1 }
 0x337   :  { %v478_v35 = vadd.f32 %v2725_v31, %v477_v34  ;;  %v487_v37 = vmax.f32 %v483_v33, 0.0 }
 0x339   :  { %v486_v36 = vmax.f32 %v478_v35, 0.0 }
 0x33b   :  { %3062 = vmatprep.mubr.msk.f32.mxu0 %vm502_vm3, %v486_v36 }
 0x33c   :  { %3063 = vmatmul.mubr.msk.f32.vlgmr.msra.gmra.mxu0 %vm502_vm3, %v487_v37 }
 0x33d   :  { %3087 = vmatpush3.xpose.msk.msra.mxu0 %vm502_vm3, %v684_v38 }
 0x33e   :  { %3088 = vmatprep.subr.msk.mxu0 %vm502_vm3, %v683_v46 }
 0x341   :  { %3089 = vmatpush3.xpose.msk.msra.mxu0 %vm502_vm3, %v683_v46 }
 0x342   :  { %3107 = vmatprep.subr.mxu0 %v3336_v47 }
 0x3fc   :  { %v3064_v40 = vpop.f32.mrf.mxu0 }
 0x3fd   :  { %v581_v41 = vadd.f32 %v3064_v40, %v2729_v39 }
 0x3fe   :  { %v575_v42 = vpop.f32.mrf.mxu0 }
 0x3ff   :  { %v576_v43 = vadd.f32 %v2729_v39, %v575_v42  ;;  %v585_v45 = vmax.f32 %v581_v41, 0.0 }
 0x401   :  { %v584_v44 = vmax.f32 %v576_v43, 0.0 }
 0x403   :  { %3083 = vmatprep.mubr.msk.f32.mxu1 %vm502_vm3, %v584_v44 }
 0x404   :  { %3084 = vmatmul.mubr.msk.f32.vlgmr.msra.gmra.mxu1 %vm502_vm3, %v585_v45 }
 0x405   :  { %3094 = vmatpush3.msra.mxu1 %v3585_v28  ;;  %3097 = vmatprep.mubr.msk.f32.mxu1 %vm780_vm4, %v777_v48 }
 0x406   :  { %3095 = vmatprep.subr.mxu1 %v3587_v30 }
 0x407   :  { %3096 = vmatpush3.msra.mxu1 %v3587_v30 }
 0x408   :  { %3098 = vmatmul.mubr.msk.f32.vlgmr.msra.gmra.mxu1 %vm780_vm4, %v778_v49 }
 0x409   :  { %3104 = vmatprep.mubr.msk.f32.mxu1 %vm780_vm4, %v777_v48 }
 0x4c4   :  { %v3085_v51 = vpop.f32.mrf.mxu1 }
 0x4c5   :  { %v678_v52 = vadd.f32 %v3085_v51, %v2732_v50 }
 0x4c6   :  { %v672_v53 = vpop.f32.mrf.mxu1 }
 0x4c7   :  { %v673_v54 = vadd.f32 %v2732_v50, %v672_v53  ;;  %v682_v56 = vmax.f32 %v678_v52, 0.0 }
 0x4c8   :  { %v3099_v0 = vpop.f32.mrf.mxu1 }
 0x4c9   :  { %v681_v55 = vmax.f32 %v673_v54, 0.0 }
 0x4ca   :  { %v853_v2 = vpop.f32.mrf.mxu1 }
 0x4cb   :  { %3090 = vmatprep.mubr.msk.f32.mxu0 %vm502_vm3, %v681_v55 }
 0x4cc   :  { %3091 = vmatmul.mubr.msk.f32.vlgmr.msra.gmra.mxu0 %vm502_vm3, %v682_v56 }
 0x4cd   :  { %3108 = vmatpush3.msra.mxu0 %v3585_v28  ;;  %3111 = vmatprep.mubr.msk.f32.mxu0 %vm3337_vm5, %v3336_v47 }
 0x4ce   :  { %3109 = vmatprep.subr.mxu0 %v3336_v47 }
 0x4cf   :  { %3110 = vmatpush3.msra.mxu0 %v3587_v30 }
 0x4d0   :  { %3112 = vmatmul.mubr.msk.f32.vlgmr.msra.gmra.mxu0 %vm780_vm4, %v779_v57  ;;  %3121 = vmatprep.subr.mxu0 %v1083_v58 }
 0x4d1   :  { %3122 = vmatpush3.msra.mxu0 %v1083_v58 }
 0x4d2   :  { %3123 = vmatprep.subr.mxu0 %v1082_v4 }
 0x4d3   :  { %3124 = vmatpush3.msra.mxu0 %v1082_v4 }
 0x4d4   :  { %3135 = vmatprep.subr.mxu0 %v3336_v47 }
 0x58c   :  { %v3092_v60 = vpop.f32.mrf.mxu0 }
 0x58d   :  { %v3643_v61 = vadd.f32 %v3092_v60, %v2735_v59 }
 0x58e   :  { %v768_v62 = vpop.f32.mrf.mxu0 }
 0x58f   :  { %v3645_v63 = vadd.f32 %v2735_v59, %v768_v62  ;;  %3100 = vmatprep.subr.mxu1 %v3643_v61 }
 0x590   :  { %3101 = vmatpush3.msra.mxu1 %v3643_v61  ;;  %v3701_v9 = vpop.f32.mrf.mxu0 }
 0x591   :  { %3102 = vmatprep.subr.mxu1 %v3645_v63 }
 0x592   :  { %3103 = vmatpush3.msra.mxu1 %v3645_v63  ;;  %v3113_v10 = vpop.f32.mrf.mxu0 }
 0x593   :  { %3105 = vmatmul.mubr.msk.f32.vlgmr.msra.gmra.mxu1 %vm780_vm4, %v778_v49  ;;  %3114 = vmatprep.subr.mxu1 %v3336_v47 }
 0x594   :  { %3115 = vmatpush3.msra.mxu1 %v3643_v61  ;;  %3118 = vmatprep.mubr.msk.f32.mxu1 %vm3337_vm5, %v3336_v47 }
 0x595   :  { %3116 = vmatprep.subr.mxu1 %v3336_v47 }
 0x596   :  { %3117 = vmatpush3.msra.mxu1 %v3645_v63 }
 0x597   :  { %3119 = vmatmul.mubr.msk.f32.vlgmr.msra.gmra.mxu1 %vm780_vm4, %v779_v57  ;;  %3128 = vmatprep.subr.mxu1 %v1081_v1 }
 0x598   :  { %3129 = vmatpush3.msra.mxu1 %v1081_v1  ;;  %3132 = vmatprep.mubr.msk.f32.mxu1 %vm780_vm4, %v853_v2 }
 0x599   :  { %3130 = vmatprep.subr.mxu1 %v1080_v3 }
 0x59a   :  { %3131 = vmatpush3.msra.mxu1 %v1080_v3 }
 0x59b   :  { %3133 = vmatmul.mubr.msk.f32.vlgmr.msra.gmra.mxu1 %vm780_vm4, %v3099_v0  ;;  %3146 = vmatprep.subr.mxu1 %v3336_v47 }
 0x59c   :  { %3154 = vmatprep.mubr.msk.f32.mxu1 %vm3337_vm5, %v3336_v47  ;;  %3147 = vmatpush3.msra.mxu1 %v3677_v5 }
 0x59d   :  { %3148 = vmatprep.subr.mxu1 %v3336_v47 }
 0x59e   :  { %3149 = vmatpush3.msra.mxu1 %v3683_v6 }
 0x59f   :  { %3150 = vmatprep.subr.mxu1 %v3336_v47 }
 0x5a0   :  { %3151 = vmatpush3.msra.mxu1 %v3690_v7 }
 0x5a1   :  { %3152 = vmatprep.subr.mxu1 %v3336_v47 }
 0x5a2   :  { %3153 = vmatpush3.msra.mxu1 %v3697_v8 }
 0x5a3   :  { %3168 = vmatprep.subr.mxu1 %v3336_v47 }
 0x653   :  { %v3106_v11 = vpop.f32.mrf.mxu1 }
 0x655   :  { %v928_v12 = vpop.f32.mrf.mxu1 }
 0x656   :  { %3125 = vmatprep.mubr.msk.f32.mxu0 %vm780_vm4, %v928_v12 }
 0x657   :  { %3126 = vmatmul.mubr.msk.f32.vlgmr.msra.gmra.mxu0 %vm780_vm4, %v3106_v11  ;;  %v3706_v13 = vpop.f32.mrf.mxu1 }
 0x658   :  { %3136 = vmatpush3.msra.mxu0 %v3677_v5  ;;  %3143 = vmatprep.mubr.msk.f32.mxu0 %vm3337_vm5, %v3336_v47 }
 0x659   :  { %3137 = vmatprep.subr.mxu0 %v3336_v47  ;;  %v3120_v14 = vpop.f32.mrf.mxu1 }
 0x65a   :  { %3138 = vmatpush3.msra.mxu0 %v3683_v6 }
 0x65b   :  { %3139 = vmatprep.subr.mxu0 %v3336_v47  ;;  %v3134_v15 = vpop.f32.mrf.mxu1 }
 0x65c   :  { %3140 = vmatpush3.msra.mxu0 %v3690_v7 }
 0x65d   :  { %3141 = vmatprep.subr.mxu0 %v3336_v47  ;;  %v1242_v19 = vpop.f32.mrf.mxu1 }
 0x65e   :  { %3142 = vmatpush3.msra.mxu0 %v3697_v8 }
 0x65f   :  { %3144 = vmatmul.mubr.f32.vlgmr.msra.gmra.mxu0 %v3336_v47  ;;  %3157 = vmatprep.subr.mxu0 %v3336_v47 }
 0x660   :  { %3158 = vmatpush3.msra.mxu0 %v3677_v5  ;;  %3165 = vmatprep.mubr.msk.f32.mxu0 %vm3337_vm5, %v3336_v47 }
 0x661   :  { %3159 = vmatprep.subr.mxu0 %v3336_v47 }
 0x662   :  { %3160 = vmatpush3.msra.mxu0 %v3683_v6 }
 0x663   :  { %3161 = vmatprep.subr.mxu0 %v3336_v47 }
 0x664   :  { %3162 = vmatpush3.msra.mxu0 %v3690_v7 }
 0x665   :  { %3163 = vmatprep.subr.mxu0 %v3336_v47 }
 0x666   :  { %3164 = vmatpush3.msra.mxu0 %v3697_v8 }
 0x667   :  { %3179 = vmatprep.subr.mxu0 %v3336_v47 }
 0x717   :  { %v3127_v16 = vpop.f32.mrf.mxu0 }
 0x718   :  { %v1248_v18 = vadd.f32 %v3134_v15, %v3127_v16 }
 0x719   :  { %v1161_v20 = vpop.f32.mrf.mxu0 }
 0x71a   :  { %v1243_v21 = vadd.f32 %v1242_v19, %v1161_v20  ;;  %v3732_v22 = vadd.f32 %v2750_v17, %v1248_v18 }
 0x71c   :  { %v3734_v23 = vadd.f32 %v2750_v17, %v1243_v21 }
 0x71f   :  { %v1327_v24 = vpop.f32.mrf.mxu0 }
 0x720   :  { %v1331_v25 = vadd.f32 %v1327_v24, %v3734_v23 }
 0x721   :  { %v3145_v26 = vpop.f32.mrf.mxu0 }
 0x722   :  { %3270 = vtanh.f32 %v1331_v25  ;;  %v2751_v29 = vmul.f32 -1.442695, %v1331_v25 }
 0x724   :  { %3272 = vpow2.f32 %v2751_v29 }
 0x72f   :  { %v3271_v27 = vpop.eup %3270 }
 0x730   :  { %1341 = vrot.lane.b32.xlu0 %v3271_v27, %s3338_s20 }
 0x731   :  { %v3273_v31 = vpop.eup %3272 }
 0x732   :  { %v1335_v32 = vadd.f32 1.0, %v3273_v31 }
 0x734   :  { %3274 = vrcp.f32 %v1335_v32 }
 0x741   :  { %v3275_v33 = vpop.eup %3274 }
 0x742   :  { %v1339_v36 = vmul.f32 0.0, %v3275_v33 }
 0x7a2   :  { %v1342_v34 = vpop.permute.xlu0 %1341 }
 0x7a3   :  { %v1344_v35 = vmul.f32 %v3275_v33, %v1342_v34 }
 0x7a5   :  { %1346 = vrot.lane.b32.xlu0 %v1344_v35, %s3338_s20 }
 0x817   :  { %v1347_v37 = vpop.permute.xlu0 %1346 }
 0x818   :  { %v1349_v38 = vadd.f32 %v1347_v37, %v1339_v36 }
 0x81a   :  { %3276 = vtanh.f32 %v1349_v38  ;;  %v1443_v55 = vrot.slane %v1349_v38, 6 }
 0x827   :  { %v3277_v39 = vpop.eup %3276 }
 0x828   :  { %1352 = vrot.lane.b32.xlu1 %v3277_v39, %s3338_s20 }
 0x89a   :  { %v1353_v40 = vpop.permute.xlu1 %1352 }
 0x89b   :  { %v1355_v41 = vmul.f32 %v3275_v33, %v1353_v40 }
 0x89d   :  { %1357 = vrot.lane.b32.xlu1 %v1355_v41, %s3339_s21 }
 0x90f   :  { %v1358_v42 = vpop.permute.xlu1 %1357 }
 0x910   :  { %3155 = vmatmul.mubr.msk.f32.vlgmr.msra.gmra.mxu1 %vm1257_vm6, %v1358_v42 }
 0x911   :  { %3169 = vmatpush3.msra.mxu1 %v3677_v5  ;;  %3176 = vmatprep.mubr.msk.f32.mxu1 %vm3337_vm5, %v3336_v47 }
 0x912   :  { %3170 = vmatprep.subr.mxu1 %v3336_v47 }
 0x913   :  { %3171 = vmatpush3.msra.mxu1 %v3683_v6 }
 0x914   :  { %3172 = vmatprep.subr.mxu1 %v3336_v47 }
 0x915   :  { %3173 = vmatpush3.msra.mxu1 %v3690_v7 }
 0x916   :  { %3174 = vmatprep.subr.mxu1 %v3336_v47 }
 0x917   :  { %3175 = vmatpush3.msra.mxu1 %v3697_v8 }
 0x918   :  { %3190 = vmatprep.subr.mxu1 %v3336_v47 }
 0x9d0   :  { %v1427_v43 = vpop.f32.mrf.mxu1 }
 0x9d1   :  { %v1432_v44 = vrot.slane %v1427_v43, 6 }
 0x9d2   :  { %v3156_v45 = vpop.f32.mrf.mxu1 }
 0x9d3   :  { %v1434_v46 = vadd.f32 %v1432_v44, %v3734_v23 }
 0x9d5   :  { %3278 = vtanh.f32 %v1434_v46  ;;  %v2753_v49 = vmul.f32 -1.442695, %v1434_v46 }
 0x9d7   :  { %3280 = vpow2.f32 %v2753_v49 }
 0x9e2   :  { %v3279_v48 = vpop.eup %3278 }
 0x9e3   :  { %1447 = vrot.lane.b32.xlu0 %v3279_v48, %s3338_s20 }
 0x9e4   :  { %v3281_v50 = vpop.eup %3280 }
 0x9e5   :  { %v1438_v51 = vadd.f32 1.0, %v3281_v50 }
 0x9e7   :  { %3282 = vrcp.f32 %v1438_v51 }
 0x9f4   :  { %v3283_v52 = vpop.eup %3282 }
 0x9f5   :  { %v1445_v56 = vmul.f32 %v3283_v52, %v1443_v55 }
 0xa55   :  { %v1448_v53 = vpop.permute.xlu0 %1447 }
 0xa56   :  { %v1450_v54 = vmul.f32 %v3283_v52, %v1448_v53 }
 0xa58   :  { %1452 = vrot.lane.b32.xlu1 %v1450_v54, %s3338_s20 }
 0xaca   :  { %v1453_v57 = vpop.permute.xlu1 %1452 }
 0xacb   :  { %v1455_v58 = vadd.f32 %v1453_v57, %v1445_v56 }
 0xacd   :  { %3284 = vtanh.f32 %v1455_v58 }
 0xada   :  { %v3285_v59 = vpop.eup %3284 }
 0xadb   :  { %1458 = vrot.lane.b32.xlu0 %v3285_v59, %s3338_s20 }
 0xb4d   :  { %v1459_v60 = vpop.permute.xlu0 %1458 }
 0xb4e   :  { %v1461_v62 = vmul.f32 %v3283_v52, %v1459_v60 }
 0xb50   :  { %v1463_v0 = vrot.slane %v1461_v62, 2 }
 0xb52   :  { %1464 = vrot.lane.b32.xlu1 %v1463_v0, %s3339_s21  ;;  %v1782_v0 = vld [vmem:[%s3998_s1 + $0x2c8] sm:$0xff] }
 0xbc4   :  { %v1465_v1 = vpop.permute.xlu1 %1464 }
 0xbc5   :  { %3166 = vmatmul.mubr.msk.f32.vlgmr.msra.gmra.mxu0 %vm1257_vm6, %v1465_v1  ;;  %v1781_v1 = vld [vmem:[%s3998_s1 + $0x2c0] sm:$0xff] }
 0xbc6   :  { %3180 = vmatpush3.msra.mxu0 %v3677_v5  ;;  %3187 = vmatprep.mubr.msk.f32.mxu0 %vm3337_vm5, %v3336_v47 }
 0xbc7   :  { %3181 = vmatprep.subr.mxu0 %v3336_v47 }
 0xbc8   :  { %3182 = vmatpush3.msra.mxu0 %v3683_v6 }
 0xbc9   :  { %3183 = vmatprep.subr.mxu0 %v3336_v47 }
 0xbca   :  { %3184 = vmatpush3.msra.mxu0 %v3690_v7 }
 0xbcb   :  { %3185 = vmatprep.subr.mxu0 %v3336_v47 }
 0xbcc   :  { %3186 = vmatpush3.msra.mxu0 %v3697_v8  ;;  %v1550_v8 = vrot.slane %v1455_v58, 6 }
 0xbcd   :  { %3201 = vmatprep.subr.mxu0 %v3336_v47 }
 0xc85   :  { %v1534_v2 = vpop.f32.mrf.mxu0 }
 0xc86   :  { %v1539_v3 = vrot.slane %v1534_v2, 4  ;;  %v1780_v2 = vld [vmem:[%s3998_s1 + $0x2b8] sm:$0xff] }
 0xc87   :  { %v3167_v4 = vpop.f32.mrf.mxu0 }
 0xc88   :  { %v1541_v5 = vadd.f32 %v1539_v3, %v3734_v23 }
 0xc8a   :  { %3286 = vtanh.f32 %v1541_v5  ;;  %v2755_v6 = vmul.f32 -1.442695, %v1541_v5 }
 0xc8c   :  { %3288 = vpow2.f32 %v2755_v6 }
 0xc97   :  { %v3287_v10 = vpop.eup %3286 }
 0xc98   :  { %1554 = vrot.lane.b32.xlu0 %v3287_v10, %s3338_s20  ;;  %v1983_v10 = vld [vmem:[%s3998_s1 + $0x320] sm:$0xff] }
 0xc99   :  { %v3289_v11 = vpop.eup %3288 }
 0xc9a   :  { %v1545_v12 = vadd.f32 1.0, %v3289_v11  ;;  %v1982_v11 = vld [vmem:[%s3998_s1 + $0x318] sm:$0xff] }
 0xc9c   :  { %3290 = vrcp.f32 %v1545_v12  ;;  %v1981_v12 = vld [vmem:[%s3998_s1 + $0x310] sm:$0xff] }
 0xca9   :  { %v3291_v7 = vpop.eup %3290 }
 0xcaa   :  { %v1552_v16 = vmul.f32 %v3291_v7, %v1550_v8  ;;  %v2760_v8 = vld [vmem:[%s3998_s1 + $0x2d8] ss:$0 sm:$0xff] }
 0xd0a   :  { %v1555_v14 = vpop.permute.xlu0 %1554 }
 0xd0b   :  { %v1557_v15 = vmul.f32 %v3291_v7, %v1555_v14  ;;  %v1901_v14 = vld [vmem:[%s3998_s1 + $0x2f8] sm:$0xff] }
 0xd0d   :  { %1559 = vrot.lane.b32.xlu1 %v1557_v15, %s3338_s20  ;;  %v1900_v15 = vld [vmem:[%s3998_s1 + $0x2f0] sm:$0xff] }
 0xd7f   :  { %v1560_v17 = vpop.permute.xlu1 %1559 }
 0xd80   :  { %v1562_v18 = vadd.f32 %v1560_v17, %v1552_v16 }
 0xd82   :  { %3292 = vtanh.f32 %v1562_v18  ;;  %v1657_v39 = vrot.slane %v1562_v18, 6 }
 0xd8f   :  { %v3293_v19 = vpop.eup %3292 }
 0xd90   :  { %1565 = vrot.lane.b32.xlu0 %v3293_v19, %s3338_s20 }
 0xe02   :  { %v1566_v20 = vpop.permute.xlu0 %1565 }
 0xe03   :  { %v1568_v21 = vmul.f32 %v3291_v7, %v1566_v20  ;;  %v1980_v7 = vld [vmem:[%s3998_s1 + $0x308] sm:$0xff] }
 0xe05   :  { %v1570_v24 = vrot.slane %v1568_v21, 4 }
 0xe07   :  { %1571 = vrot.lane.b32.xlu1 %v1570_v24, %s3339_s21  ;;  %v2766_v24 = vld [vmem:[%s3998_s1 + $0x328] ss:$0 sm:$0xff] }
 0xe79   :  { %v1572_v25 = vpop.permute.xlu1 %1571 }
 0xe7a   :  { %3177 = vmatmul.mubr.msk.f32.vlgmr.msra.gmra.mxu1 %vm1257_vm6, %v1572_v25 }
 0xe7b   :  { %3198 = vmatprep.mubr.msk.f32.mxu1 %vm3337_vm5, %v3336_v47 }
 0xf3a   :  { %v1641_v26 = vpop.f32.mrf.mxu1 }
 0xf3b   :  { %v1646_v27 = vrot.slane %v1641_v26, 2 }
 0xf3c   :  { %v3178_v29 = vpop.f32.mrf.mxu1 }
 0xf3d   :  { %v1648_v31 = vadd.f32 %v1646_v27, %v3734_v23 }
 0xf3f   :  { %3294 = vtanh.f32 %v1648_v31  ;;  %v2757_v33 = vmul.f32 -1.442695, %v1648_v31 }
 0xf41   :  { %3296 = vpow2.f32 %v2757_v33 }
 0xf4c   :  { %v3295_v32 = vpop.eup %3294 }
 0xf4d   :  { %1661 = vrot.lane.b32.xlu0 %v3295_v32, %s3338_s20 }
 0xf4e   :  { %v3297_v34 = vpop.eup %3296 }
 0xf4f   :  { %v1652_v35 = vadd.f32 1.0, %v3297_v34 }
 0xf51   :  { %3298 = vrcp.f32 %v1652_v35 }
 0xf5e   :  { %v3299_v36 = vpop.eup %3298 }
 0xf5f   :  { %v1659_v40 = vmul.f32 %v3299_v36, %v1657_v39 }
 0xfbf   :  { %v1662_v37 = vpop.permute.xlu0 %1661 }
 0xfc0   :  { %v1664_v38 = vmul.f32 %v3299_v36, %v1662_v37 }
 0xfc2   :  { %1666 = vrot.lane.b32.xlu1 %v1664_v38, %s3338_s20 }
0x1034   :  { %v1667_v41 = vpop.permute.xlu1 %1666 }
0x1035   :  { %v1669_v42 = vadd.f32 %v1667_v41, %v1659_v40 }
0x1037   :  { %3300 = vtanh.f32 %v1669_v42  ;;  %v1761_v58 = vrot.slane %v1669_v42, 6 }
0x1044   :  { %v3301_v23 = vpop.eup %3300 }
0x1045   :  { %1672 = vrot.lane.b32.xlu0 %v3301_v23, %s3338_s20 }
0x10b7   :  { %v1673_v43 = vpop.permute.xlu0 %1672 }
0x10b8   :  { %v1675_v44 = vmul.f32 %v3299_v36, %v1673_v43 }
0x10ba   :  { %v1677_v45 = vrot.slane %v1675_v44, 6 }
0x10bc   :  { %1678 = vrot.lane.b32.xlu1 %v1677_v45, %s3339_s21 }
0x112e   :  { %v1679_v46 = vpop.permute.xlu1 %1678 }
0x112f   :  { %3188 = vmatmul.mubr.msk.f32.vlgmr.msra.gmra.mxu0 %vm1257_vm6, %v1679_v46  ;;  %v2762_v46 = vld [vmem:[%s3998_s1 + $0x2e0] ss:$0 sm:$0xff] }
0x1130   :  { %3205 = vmatprep.mubr.msk.f32.mxu0 %vm3337_vm5, %v3336_v47  ;;  %3202 = vmatpush3.msra.mxu0 %v1901_v14 }
0x1131   :  { %3203 = vmatprep.subr.mxu0 %v3336_v47 }
0x1132   :  { %3204 = vmatpush3.msra.mxu0 %v1900_v15 }
0x1133   :  { %3219 = vmatprep.subr.mxu0 %v3336_v47 }
0x11ef   :  { %v1748_v48 = vpop.f32.mrf.mxu0 }
0x11f0   :  { %v1752_v49 = vadd.f32 %v1748_v48, %v3732_v22  ;;  %v1783_v22 = vld [vmem:[%s3998_s1 + $0x2d0] sm:$0xff] }
0x11f1   :  { %v3189_v50 = vpop.f32.mrf.mxu0  ;;  %3191 = vmatpush3.msra.mxu1 %v1783_v22 }
0x11f2   :  { %3302 = vtanh.f32 %v1752_v49  ;;  %v2759_v52 = vmul.f32 -1.442695, %v1752_v49  ;;  %3192 = vmatprep.subr.mxu1 %v3336_v47  ;;  %v2763_v49 = vld [vmem:[%s3998_s1 + $0x2e8] ss:$0 sm:$0xff] }
0x11f3   :  { %3193 = vmatpush3.msra.mxu1 %v1782_v0 }
0x11f4   :  { %3304 = vpow2.f32 %v2759_v52  ;;  %3194 = vmatprep.subr.mxu1 %v3336_v47 }
0x11f5   :  { %3195 = vmatpush3.msra.mxu1 %v1781_v1 }
0x11f6   :  { %3196 = vmatprep.subr.mxu1 %v3336_v47 }
0x11f7   :  { %3197 = vmatpush3.msra.mxu1 %v1780_v2 }
0x11f8   :  { %3208 = vmatprep.subr.mxu1 %v3336_v47 }
0x11ff   :  { %v3303_v51 = vpop.eup %3302 }
0x1200   :  { %1765 = vrot.lane.b32.xlu0 %v3303_v51, %s3338_s20 }
0x1201   :  { %v3305_v53 = vpop.eup %3304 }
0x1202   :  { %v1756_v54 = vadd.f32 1.0, %v3305_v53 }
0x1204   :  { %3306 = vrcp.f32 %v1756_v54 }
0x1211   :  { %v3307_v55 = vpop.eup %3306 }
0x1212   :  { %v1763_v59 = vmul.f32 %v3307_v55, %v1761_v58 }
0x1272   :  { %v1766_v56 = vpop.permute.xlu0 %1765 }
0x1273   :  { %v1768_v57 = vmul.f32 %v3307_v55, %v1766_v56  ;;  %v2268_v56 = vrot.slane %v3706_v13, 4 }
0x1275   :  { %1770 = vrot.lane.b32.xlu1 %v1768_v57, %s3338_s20 }
0x12e7   :  { %v1771_v60 = vpop.permute.xlu1 %1770 }
0x12e8   :  { %v1773_v62 = vadd.f32 %v1771_v60, %v1763_v59  ;;  %v2475_v59 = vrot.slane %v3701_v9, 2  ;;  %v2577_v60 = vrot.slane %v3701_v9, 4 }
0x12ea   :  { %3308 = vtanh.f32 %v1773_v62 }
0x12f7   :  { %v3309_v3 = vpop.eup %3308 }
0x12f8   :  { %1776 = vrot.lane.b32.xlu0 %v3309_v3, %s3338_s20 }
0x136a   :  { %v1777_v4 = vpop.permute.xlu0 %1776 }
0x136b   :  { %v1779_v5 = vmul.f32 %v3307_v55, %v1777_v4  ;;  %v2166_v55 = vrot.slane %v3706_v13, 2 }
0x136d   :  { %1790 = vrot.lane.b32.xlu1 %v1779_v5, %s3339_s21 }
0x13df   :  { %v3808_v6 = vpop.permute.xlu1 %1790 }
0x13e0   :  { %3199 = vmatmul.mubr.msk.f32.vlgmr.msra.gmra.mxu1 %vm1257_vm6, %v3808_v6 }
0x13e1   :  { %3209 = vmatpush3.msra.mxu1 %v1983_v10  ;;  %3216 = vmatprep.mubr.msk.f32.mxu1 %vm3337_vm5, %v3336_v47 }
0x13e2   :  { %3210 = vmatprep.subr.mxu1 %v3336_v47 }
0x13e3   :  { %3211 = vmatpush3.msra.mxu1 %v1982_v11 }
0x13e4   :  { %3212 = vmatprep.subr.mxu1 %v3336_v47 }
0x13e5   :  { %3213 = vmatpush3.msra.mxu1 %v1981_v12 }
0x13e6   :  { %3214 = vmatprep.subr.mxu1 %v3336_v47 }
0x13e7   :  { %3215 = vmatpush3.msra.mxu1 %v1980_v7 }
0x13e8   :  { %3217 = vmatmul.mubr.msk.f32.vlgmr.msra.gmra.mxu1 %vm1257_vm6, %v3808_v6  ;;  %3229 = vmatprep.subr.mxu1 %v3336_v47 }
0x13e9   :  { %3231 = vmatprep.mubr.msk.f32.mxu1 %vm3337_vm5, %v3336_v47 }
0x14a0   :  { %v1860_v16 = vpop.f32.mrf.mxu1 }
0x14a1   :  { %v1861_v17 = vadd.f32 %v2760_v8, %v1860_v16 }
0x14a2   :  { %v3200_v18 = vpop.f32.mrf.mxu1 }
0x14a3   :  { %v1865_v19 = vsel %vm1864_vm7, %v1861_v17, 0.0 }
0x14a4   :  { %v1866_v20 = vrot.slane %v1865_v19, 4 }
0x14a6   :  { %v1867_v21 = vadd.f32 %v1866_v20, %v1865_v19 }
0x14a8   :  { %v1868_v25 = vrot.slane %v1867_v21, 2  ;;  %v2055_v26 = vpop.f32.mrf.mxu1 }
0x14a9   :  { %v2056_v27 = vadd.f32 %v2766_v24, %v2055_v26 }
0x14aa   :  { %v1869_v29 = vadd.f32 %v1868_v25, %v1867_v21  ;;  %v3218_v31 = vpop.f32.mrf.mxu1 }
0x14ab   :  { %2269 = vrot.lane.b32.xlu1 %v2056_v27, %s3340_s17  ;;  %2167 = vrot.lane.b32.xlu0 %v2056_v27, %s3341_s18 }
0x14ac   :  { %v1870_v32 = vrot.slane %v1869_v29, 1 }
0x14ae   :  { %v1871_v33 = vadd.f32 %v1870_v32, %v1869_v29 }
0x14af   :  { %2476 = vrot.lane.b32.xlu1 %v2056_v27, %s3339_s21  ;;  %2373 = vrot.lane.b32.xlu0 %v2056_v27, %s3342_s19 }
0x14b0   :  { %v1873_v34 = vmul.f32 0.5, %v1871_v33 }
0x14b2   :  { %v1874_v35 = vsub.f32 %v1861_v17, %v1873_v34 }
0x14b3   :  { %2578 = vrot.lane.b32.xlu0 %v2056_v27, %s3343_s22 }
0x14b4   :  { %v1875_v36 = vmul.f32 %v1874_v35, %v1874_v35 }
0x14b6   :  { %v1876_v37 = vsel %vm1864_vm7, %v1875_v36, 0.0 }
0x14b7   :  { %v1877_v38 = vrot.slane %v1876_v37, 4 }
0x14b9   :  { %v1878_v39 = vadd.f32 %v1877_v38, %v1876_v37 }
0x14bb   :  { %v1879_v40 = vrot.slane %v1878_v39, 2 }
0x14bd   :  { %v1880_v41 = vadd.f32 %v1879_v40, %v1878_v39 }
0x14bf   :  { %v1881_v42 = vrot.slane %v1880_v41, 1 }
0x14c1   :  { %v1882_v23 = vadd.f32 %v1881_v42, %v1880_v41 }
0x14c3   :  { %v1883_v43 = vmul.f32 0.5, %v1882_v23 }
0x14c5   :  { %v1884_v44 = vadd.f32 1e-05, %v1883_v43 }
0x14c7   :  { %3310 = vrsqrt.f32 %v1884_v44 }
0x14d4   :  { %v3311_v45 = vpop.eup %3310 }
0x14d5   :  { %v1886_v48 = vmul.f32 %v3311_v45, %v1874_v35 }
0x14d7   :  { %v1892_v50 = vmul.f32 %v2762_v46, %v1886_v48 }
0x14d9   :  { %v1898_v51 = vadd.f32 %v2763_v49, %v1892_v50 }
0x14db   :  { %v1899_v52 = vmax.f32 %v1898_v51, 0.0 }
0x14dd   :  { %3206 = vmatmul.mubr.msk.f32.vlgmr.msra.gmra.mxu0 %vm780_vm4, %v1899_v52 }
0x14de   :  { %3220 = vmatpush3.xpose.msk.msra.mxu0 %vm780_vm4, %v2056_v27  ;;  %3221 = vmatprep.mubr.msk.f32.mxu0 %vm3337_vm5, %v3336_v47 }
0x14df   :  { %3224 = vmatprep.subr.mxu0 %v3336_v47 }
0x14e1   :  { %3222 = vmatmul.mubr.msk.f32.vlgmr.msra.gmra.mxu0 %vm780_vm4, %v3706_v13 }
0x14e2   :  { %3226 = vmatprep.mubr.msk.f32.mxu0 %vm3337_vm5, %v3336_v47 }
0x151d   :  { %v2270_v53 = vpop.permute.xlu1 %2269  ;;  %v2168_v54 = vpop.permute.xlu0 %2167 }
0x151e   :  { %3225 = vmatpush3.xpose.msk.msra.mxu0 %vm780_vm4, %v2168_v54  ;;  %3230 = vmatpush3.xpose.msk.msra.mxu1 %vm780_vm4, %v2270_v53  ;;  %v2059_v54 = vlaneseq }
0x151f   :  { %3239 = vmatprep.subr.mxu1 %v3336_v47  ;;  %3234 = vmatprep.subr.mxu0 %v3336_v47 }
0x1521   :  { %3232 = vmatmul.mubr.msk.f32.vlgmr.msra.gmra.mxu1 %vm780_vm4, %v2268_v56  ;;  %v2477_v57 = vpop.permute.xlu1 %2476  ;;  %v2374_v58 = vpop.permute.xlu0 %2373  ;;  %3227 = vmatmul.mubr.msk.f32.vlgmr.msra.gmra.mxu0 %vm780_vm4, %v2166_v55  ;;  %v2060_v56 = vshrl.u32 %v2059_v54, 7 }
0x1522   :  { %3235 = vmatpush3.xpose.msk.msra.mxu0 %vm780_vm4, %v2374_v58  ;;  %3240 = vmatpush3.xpose.msk.msra.mxu1 %vm780_vm4, %v2477_v57  ;;  %v3937_v57 = vand.u32 127, %v2059_v54 }
0x1523   :  { %3236 = vmatprep.mubr.msk.f32.mxu0 %vm3337_vm5, %v3336_v47  ;;  %3241 = vmatprep.mubr.msk.f32.mxu1 %vm3337_vm5, %v3336_v47 }
0x1524   :  { %3244 = vmatprep.subr.mxu0 %v3336_v47  ;;  %vm3940_vm9 = vcmp.eq.s32.totalorder %v2060_v56, %v3937_v57  ;;  %vm2703_vm10 = vcmp.eq.s32.totalorder %v3937_v57, 1  ;;  %vm2702_vm12 = vcmp.eq.s32.totalorder %v3937_v57, 0 }
0x1525   :  { %3242 = vmatmul.mubr.msk.f32.vlgmr.msra.gmra.mxu1 %vm780_vm4, %v2475_v59  ;;  %v2579_v13 = vpop.permute.xlu0 %2578  ;;  %3237 = vmatmul.mubr.msk.f32.vlgmr.msra.gmra.mxu0 %vm780_vm4, %v3701_v9 }
0x1526   :  { %3245 = vmatpush3.xpose.msk.msra.mxu0 %vm780_vm4, %v2579_v13  ;;  %3246 = vmatprep.mubr.msk.f32.mxu0 %vm3337_vm5, %v3336_v47 }
0x1529   :  { %3247 = vmatmul.mubr.msk.f32.vlgmr.msra.gmra.mxu0 %vm780_vm4, %v2577_v60 }
0x159d   :  { %v3887_v62 = vpop.f32.mrf.mxu0 }
0x159f   :  { %v3207_v22 = vpop.f32.mrf.mxu0 }
0x15a1   :  { %v3889_v0 = vpop.f32.mrf.mxu0 }
0x15a2   :  { %v2141_v1 = vsel %vm2140_vm8, %v3889_v0, -inf }
0x15a3   :  { %2142 = vmax.xlane.f32.xlu1 %v2141_v1  ;;  %v3223_v2 = vpop.f32.mrf.mxu0 }
0x15e1   :  { %v3893_v3 = vpop.f32.mrf.mxu0  ;;  %v3895_v4 = vpop.f32.mrf.mxu1 }
0x15e2   :  { %v2243_v47 = vsel %vm2140_vm8, %v3893_v3, -inf  ;;  %v2345_v7 = vsel %vm2140_vm8, %v3895_v4, -inf }
0x15e3   :  { %2244 = vmax.xlane.f32.xlu0 %v2243_v47  ;;  %v3228_v9 = vpop.f32.mrf.mxu0  ;;  %v3233_v5 = vpop.f32.mrf.mxu1 }
0x15e5   :  { %v3899_v10 = vpop.f32.mrf.mxu0  ;;  %v3901_v11 = vpop.f32.mrf.mxu1 }
0x15e6   :  { %v2450_v12 = vsel %vm2140_vm8, %v3899_v10, -inf  ;;  %v2552_v17 = vsel %vm2140_vm8, %v3901_v11, -inf }
0x15e7   :  { %2451 = vmax.xlane.f32.xlu1 %v2450_v12  ;;  %v3238_v14 = vpop.f32.mrf.mxu0  ;;  %2346 = vmax.xlane.f32.xlu0 %v2345_v7  ;;  %v3243_v15 = vpop.f32.mrf.mxu1 }
0x15e9   :  { %v3907_v8 = vpop.f32.mrf.mxu0 }
0x15ea   :  { %v2654_v16 = vsel %vm2140_vm8, %v3907_v8, -inf }
0x15eb   :  { %2655 = vmax.xlane.f32.xlu1 %v2654_v16  ;;  %v3248_v18 = vpop.f32.mrf.mxu0  ;;  %2553 = vmax.xlane.f32.xlu0 %v2552_v17 }
0x162c   :  { %v2143_v19 = vpop.xlane.xlu1 %2142 }
0x162d   :  { %v2144_v20 = vsub.f32 %v3889_v0, %v2143_v19 }
0x162f   :  { %v2145_v21 = vmul.f32 1.442695, %v2144_v20 }
0x1631   :  { %3312 = vpow2.f32 %v2145_v21 }
0x163e   :  { %v3313_v24 = vpop.eup %3312 }
0x163f   :  { %v2147_v25 = vsel %vm2140_vm8, %v3313_v24, 0.0 }
0x1640   :  { %2148 = vadd.xlane.f32.xlu0 %v2147_v25 }
0x166c   :  { %v2245_v26 = vpop.xlane.xlu0 %2244 }
0x166d   :  { %v2246_v27 = vsub.f32 %v3893_v3, %v2245_v26 }
0x166f   :  { %v2247_v29 = vmul.f32 1.442695, %v2246_v27 }
0x1670   :  { %v3916_v31 = vpop.xlane.xlu1 %2451  ;;  %v3918_v32 = vpop.xlane.xlu0 %2346 }
0x1671   :  { %3314 = vpow2.f32 %v2247_v29  ;;  %v2453_v33 = vsub.f32 %v3899_v10, %v3916_v31  ;;  %v2348_v34 = vsub.f32 %v3895_v4, %v3918_v32 }
0x1673   :  { %v2454_v35 = vmul.f32 1.442695, %v2453_v33  ;;  %v2349_v36 = vmul.f32 1.442695, %v2348_v34 }
0x1674   :  { %v3924_v37 = vpop.xlane.xlu1 %2655  ;;  %v3926_v38 = vpop.xlane.xlu0 %2553 }
0x1675   :  { %3316 = vpow2.f32 %v2454_v35  ;;  %v2657_v39 = vsub.f32 %v3907_v8, %v3924_v37  ;;  %v2555_v40 = vsub.f32 %v3901_v11, %v3926_v38 }
0x1676   :  { %3318 = vpow2.f32 %v2349_v36 }
0x1677   :  { %v2658_v41 = vmul.f32 1.442695, %v2657_v39  ;;  %v2556_v42 = vmul.f32 1.442695, %v2555_v40 }
0x1679   :  { %3320 = vpow2.f32 %v2658_v41 }
0x167a   :  { %3322 = vpow2.f32 %v2556_v42 }
0x167e   :  { %v3315_v23 = vpop.eup %3314 }
0x167f   :  { %v2249_v43 = vsel %vm2140_vm8, %v3315_v23, 0.0 }
0x1680   :  { %2250 = vadd.xlane.f32.xlu1 %v2249_v43 }
0x1682   :  { %v3317_v44 = vpop.eup %3316 }
0x1683   :  { %v3319_v45 = vpop.eup %3318  ;;  %v2456_v46 = vsel %vm2140_vm8, %v3317_v44, 0.0 }
0x1684   :  { %2457 = vadd.xlane.f32.xlu1 %v2456_v46  ;;  %v2351_v48 = vsel %vm2140_vm8, %v3319_v45, 0.0 }
0x1685   :  { %2352 = vadd.xlane.f32.xlu0 %v2351_v48 }
0x1686   :  { %v3321_v49 = vpop.eup %3320 }
0x1687   :  { %v3323_v50 = vpop.eup %3322  ;;  %v2660_v51 = vsel %vm2140_vm8, %v3321_v49, 0.0 }
0x1688   :  { %2661 = vadd.xlane.f32.xlu1 %v2660_v51  ;;  %v2558_v52 = vsel %vm2140_vm8, %v3323_v50, 0.0 }
0x1689   :  { %2559 = vadd.xlane.f32.xlu0 %v2558_v52 }
0x16c9   :  { %v2149_v53 = vpop.xlane.xlu0 %2148 }
0x16ca   :  { %3324 = vlog2.f32 %v2149_v53 }
0x16d7   :  { %v3325_v55 = vpop.eup %3324 }
0x16d8   :  { %v2151_v58 = vmul.f32 0.6931472, %v3325_v55 }
0x16da   :  { %v2152_v59 = vadd.f32 %v2151_v58, %v2143_v19 }
0x16dc   :  { %v2153_v60 = vsub.f32 %v3889_v0, %v2152_v59 }
0x16de   :  { %v2154_v22 = vsel %vm3940_vm9, %v2153_v60, 0.0 }
0x16df   :  { %v2155_v1 = vsel %vm2140_vm8, %v2154_v22, 0.0 }
0x16e0   :  { %2156 = vadd.xlane.f32.xlu0 %v2155_v1 }
0x1709   :  { %v2251_v2 = vpop.xlane.xlu1 %2250 }
0x170a   :  { %3326 = vlog2.f32 %v2251_v2 }
0x170d   :  { %v2458_v47 = vpop.xlane.xlu1 %2457 }
0x170e   :  { %3328 = vlog2.f32 %v2458_v47  ;;  %v2353_v9 = vpop.xlane.xlu0 %2352 }
0x170f   :  { %3330 = vlog2.f32 %v2353_v9 }
0x1711   :  { %v2662_v5 = vpop.xlane.xlu1 %2661 }
0x1712   :  { %3332 = vlog2.f32 %v2662_v5  ;;  %v2560_v12 = vpop.xlane.xlu0 %2559 }
0x1713   :  { %3334 = vlog2.f32 %v2560_v12 }
0x1717   :  { %v3327_v7 = vpop.eup %3326 }
0x1718   :  { %v2253_v14 = vmul.f32 0.6931472, %v3327_v7 }
0x171a   :  { %v2254_v15 = vadd.f32 %v2253_v14, %v2245_v26 }
0x171b   :  { %v3329_v0 = vpop.eup %3328 }
0x171c   :  { %v3331_v16 = vpop.eup %3330  ;;  %v2460_v17 = vmul.f32 0.6931472, %v3329_v0  ;;  %v2255_v18 = vsub.f32 %v3893_v3, %v2254_v15 }
0x171d   :  { %v2355_v19 = vmul.f32 0.6931472, %v3331_v16 }
0x171e   :  { %v2256_v20 = vsel %vm3940_vm9, %v2255_v18, 0.0  ;;  %v2461_v21 = vadd.f32 %v2460_v17, %v3916_v31 }
0x171f   :  { %v3333_v24 = vpop.eup %3332  ;;  %v2257_v25 = vsel %vm2140_vm8, %v2256_v20, 0.0  ;;  %v2356_v27 = vadd.f32 %v2355_v19, %v3918_v32 }
0x1720   :  { %v3335_v29 = vpop.eup %3334  ;;  %v2664_v33 = vmul.f32 0.6931472, %v3333_v24  ;;  %2258 = vadd.xlane.f32.xlu1 %v2257_v25  ;;  %v2462_v26 = vsub.f32 %v3899_v10, %v2461_v21 }
0x1721   :  { %v2562_v34 = vmul.f32 0.6931472, %v3335_v29  ;;  %v2357_v35 = vsub.f32 %v3895_v4, %v2356_v27 }
0x1722   :  { %v2463_v3 = vsel %vm3940_vm9, %v2462_v26, 0.0  ;;  %v2665_v36 = vadd.f32 %v2664_v33, %v3924_v37 }
0x1723   :  { %v2464_v31 = vsel %vm2140_vm8, %v2463_v3, 0.0  ;;  %v2358_v39 = vsel %vm3940_vm9, %v2357_v35, 0.0  ;;  %v2563_v32 = vadd.f32 %v2562_v34, %v3926_v38  ;;  %v2764_v38 = vld [vmem:[%s3998_s1 + $0x300] ss:$0 sm:$0xff] }
0x1724   :  { %2465 = vadd.xlane.f32.xlu1 %v2464_v31  ;;  %v2359_v40 = vsel %vm2140_vm8, %v2358_v39, 0.0  ;;  %v2666_v10 = vsub.f32 %v3907_v8, %v2665_v36 }
0x1725   :  { %2360 = vadd.xlane.f32.xlu0 %v2359_v40  ;;  %v2564_v4 = vsub.f32 %v3901_v11, %v2563_v32  ;;  %v1977_v11 = vadd.f32 %v2764_v38, %v3887_v62 }
0x1726   :  { %v2667_v41 = vsel %vm3940_vm9, %v2666_v10, 0.0 }
0x1727   :  { %v2668_v37 = vsel %vm2140_vm8, %v2667_v41, 0.0  ;;  %v2565_v42 = vsel %vm3940_vm9, %v2564_v4, 0.0 }
0x1728   :  { %2669 = vadd.xlane.f32.xlu1 %v2668_v37  ;;  %v2566_v23 = vsel %vm2140_vm8, %v2565_v42, 0.0 }
0x1729   :  { %2567 = vadd.xlane.f32.xlu0 %v2566_v23 }
0x1739   :  { %2686 = vrot.lane.b32.xlu1 %v3643_v61, %s3344_s28 }
0x173d   :  { %2696 = vrot.lane.b32.xlu1 %v1977_v11, %s3338_s20 }
0x173f   :  { %2684 = vrot.lane.b32.xlu0 %v3645_v63, %s3344_s28 }
0x1769   :  { %v2157_v8 = vpop.xlane.xlu0 %2156 }
0x176a   :  { %v2158_v43 = vrot.slane %v2157_v8, 4 }
0x176c   :  { %v2159_v44 = vadd.f32 %v2158_v43, %v2157_v8 }
0x176e   :  { %v2160_v45 = vrot.slane %v2159_v44, 2 }
0x1770   :  { %v2161_v46 = vadd.f32 %v2160_v45, %v2159_v44 }
0x1772   :  { %v2162_v48 = vrot.slane %v2161_v46, 1 }
0x1774   :  { %v2163_v49 = vadd.f32 %v2162_v48, %v2161_v46 }
0x1776   :  { %3249 = vpush %v2163_v49 }
0x17a7   :  { %s3250_s3 = spop %3249 }
0x17a9   :  { %v2259_v50 = vpop.xlane.xlu1 %2258 }
0x17aa   :  { %v2260_v51 = vrot.slane %v2259_v50, 4 }
0x17ac   :  { %v2261_v52 = vadd.f32 %v2260_v51, %v2259_v50 }
0x17ad   :  { %v2466_v53 = vpop.xlane.xlu1 %2465 }
0x17ae   :  { %v2262_v54 = vrot.slane %v2261_v52, 2  ;;  %v2467_v61 = vrot.slane %v2466_v53, 4  ;;  %v2361_v55 = vpop.xlane.xlu0 %2360 }
0x17af   :  { %v2362_v62 = vrot.slane %v2361_v55, 4 }
0x17b0   :  { %v2468_v56 = vadd.f32 %v2467_v61, %v2466_v53  ;;  %v2263_v58 = vadd.f32 %v2262_v54, %v2261_v52 }
0x17b1   :  { %v2363_v59 = vadd.f32 %v2362_v62, %v2361_v55  ;;  %v2670_v63 = vpop.xlane.xlu1 %2669 }
0x17b2   :  { %v2469_v13 = vrot.slane %v2468_v56, 2  ;;  %v2671_v60 = vrot.slane %v2670_v63, 4  ;;  %v2568_v22 = vpop.xlane.xlu0 %2567  ;;  %v2264_v1 = vrot.slane %v2263_v58, 1 }
0x17b3   :  { %v2364_v2 = vrot.slane %v2363_v59, 2  ;;  %v2569_v47 = vrot.slane %v2568_v22, 4 }
0x17b4   :  { %v2672_v9 = vadd.f32 %v2671_v60, %v2670_v63  ;;  %v2265_v5 = vadd.f32 %v2264_v1, %v2263_v58  ;;  %v2470_v12 = vadd.f32 %v2469_v13, %v2468_v56 }
0x17b5   :  { %v2570_v7 = vadd.f32 %v2569_v47, %v2568_v22  ;;  %v2687_v14 = vpop.permute.xlu1 %2686  ;;  %v2365_v15 = vadd.f32 %v2364_v2, %v2363_v59 }
0x17b6   :  { %v2673_v0 = vrot.slane %v2672_v9, 2  ;;  %v2691_v16 = vsel %vm780_vm4, %v3585_v28, %v2687_v14  ;;  %v2685_v17 = vpop.permute.xlu0 %2684  ;;  %3251 = vpush %v2265_v5  ;;  %v2471_v18 = vrot.slane %v2470_v12, 1 }
0x17b7   :  { %v2571_v19 = vrot.slane %v2570_v7, 2  ;;  %v2693_v20 = vsel %vm1257_vm6, %v2691_v16, 0.0  ;;  %v2690_v21 = vsel %vm780_vm4, %v3587_v30, %v2685_v17  ;;  %v2366_v24 = vrot.slane %v2365_v15, 1 }
0x17b8   :  { %2713 = vst [vmem:[%s4000_s2 + $0x8] sm:$0xff] %v2693_v20  ;;  %v2692_v25 = vsel %vm1257_vm6, %v2690_v21, 0.0  ;;  %v2472_v27 = vadd.f32 %v2471_v18, %v2470_v12  ;;  %v2674_v29 = vadd.f32 %v2673_v0, %v2672_v9 }
0x17b9   :  { %2712 = vst [vmem:[%s4000_s2] sm:$0xff] %v2692_v25  ;;  %v2367_v28 = vadd.f32 %v2366_v24, %v2365_v15  ;;  %v2572_v33 = vadd.f32 %v2571_v19, %v2570_v7  ;;  %v2697_v3 = vpop.permute.xlu1 %2696 }
0x17ba   :  { %v2675_v26 = vrot.slane %v2674_v29, 1  ;;  %v2699_v36 = vsel %vm1257_vm6, %v3808_v6, %v2697_v3 }
0x17bb   :  { %3253 = vpush %v2367_v28  ;;  %v2573_v34 = vrot.slane %v2572_v33, 1  ;;  %v2701_v40 = vsel %vm2700_vm11, %v2699_v36, 0.0 }
0x17bc   :  { %3255 = vpush %v2472_v27  ;;  %v2676_v30 = vadd.f32 %v2675_v26, %v2674_v29 }
0x17bd   :  { %v2574_v35 = vadd.f32 %v2573_v34, %v2572_v33 }
0x17bf   :  { %3257 = vpush %v2574_v35 }
0x17c0   :  { %3259 = vpush %v2676_v30 }
0x17e7   :  { %s3252_s4 = spop %3251 }
0x17e8   :  { %s2267_s6 = sadd.f32 %s3252_s4, %s3250_s3 }
0x17ec   :  { %s3254_s5 = spop %3253 }
0x17ed   :  { %s3256_s7 = spop %3255  ;;  %s2369_s8 = sadd.f32 %s3254_s5, %s2267_s6 }
0x17ef   :  { %s2372_s0 = smul.f32 -0.16666667, %s2369_s8 }
0x17f0   :  { %s3258_s9 = spop %3257 }
0x17f1   :  { %s2576_s10 = sadd.f32 %s3258_s9, %s3256_s7  ;;  %s3260_s11 = spop %3259  ;;  %v2706_v39 = vstv %s2372_s0 }
0x17f3   :  { %s2678_s12 = sadd.f32 %s3260_s11, %s2576_s10 }
0x17f5   :  { %s2681_s13 = smul.f32 -0.16666667, %s2678_s12 }
0x17f7   :  { %v2704_v31 = vstv %s2681_s13 }
0x17f8   :  { %v2705_v32 = vsel %vm2703_vm10, %v2704_v31, 0.0 }
0x17f9   :  { %v2707_v10 = vsel %vm2702_vm12, %v2706_v39, %v2705_v32 }
0x17fa   :  { %v2709_v4 = vsel %vm2708_vm13, %v2701_v40, %v2707_v10 }
0x17fb   :  { %v2711_v41 = vsel %vm2710_vm14, %v2709_v4, 0.0 }
0x17fc   :  { %2714 = vst [vmem:[%s4000_s2 + $0x10] sm:$0xff] %v2711_v41 }

</bundles_post_ra>
